<compile_context>
chip_gen: v5e
topology: v5e:2x2
jax: 0.10.0
libtpu: 0.0.40
codegen_flags: <defaults>
</compile_context>

<pallas_src>
import functools
import math

import jax
import jax.numpy as jnp
from jax.experimental import pallas as pl
from jax.experimental.pallas import tpu as pltpu


def _round_up(a, m):
    return (a + m - 1) // m * m


def _cheb_kernel(lap_ref, x_ref, w_ref, b_ref, o_ref, acc_ref, *, K):
    """One grid point = one (batch, time-block) tile.

    lap_ref: (Np, Np)          laplacian for this batch (resident across t blocks)
    x_ref:   (Np, TT*C)        node features, TT timesteps fused into lanes
    w_ref:   (K, TT*C, TT*F)   per-order block-diagonal linear weights
    b_ref:   (1, TT*F)         bias tiled over the TT timesteps
    o_ref:   (Np, TT*F)        lane-dense output tile
    acc_ref: (Np, TT*F) f32    explicit VMEM accumulator scratch
    """
    x0 = x_ref[...]                                             # (Np, TT*C)

    # k = 0 term; bias folded in once per output tile.
    acc_ref[...] = jnp.dot(x0, w_ref[0], preferred_element_type=jnp.float32)
    acc_ref[...] += b_ref[...].astype(jnp.float32)              # (1, TT*F) bcast

    if K > 1:
        lap = lap_ref[...]                                      # (Np, Np)
        # x1 = L @ x0 -- wide RHS (TT*C lanes), f32 accumulation on the MXU.
        x1 = jnp.dot(lap, x0,
                     preferred_element_type=jnp.float32).astype(x0.dtype)
        acc_ref[...] += jnp.dot(x1, w_ref[1],
                                preferred_element_type=jnp.float32)
        # Keep Chebyshev state in the input dtype (halves VMEM for bf16 inputs
        # and feeds the MXU at full rate); the combine stays f32.
        x_prev = x0
        x_cur = x1
        for k in range(2, K):
            x_next = (2.0 * jnp.dot(lap, x_cur,
                                    preferred_element_type=jnp.float32)
                      - x_prev.astype(jnp.float32)).astype(x0.dtype)
            acc_ref[...] += jnp.dot(x_next, w_ref[k],
                                    preferred_element_type=jnp.float32)
            x_prev, x_cur = x_cur, x_next

    o_ref[...] = acc_ref[...].astype(o_ref.dtype)


def _choose_tt(T, C, F_out, target_tc=256):
    """Pick the time-block size TT.

    TT is a multiple of the smallest granule g for which TT*C and TT*F are
    multiples of 128 (lane-dense x / weight / output blocks), scaled toward the
    MXU contraction width (TT*C ~= 256 for v6e/v7x; 128-aligned works on v5e
    too).  If the granule already exceeds T, fall back to a single full-time
    block (full-extent blocks are exempt from the 128-divisibility rule).
    """
    g = 128 // math.gcd(C, 128)
    g *= 128 // math.gcd(g * F_out, 128)
    if g >= T:
        return T
    mult = max(1, target_tc // (g * C))
    return min(g * mult, _round_up(T, g))


def _vmem_limit_bytes(Np, TTC, TTF, K, x_itemsize, lap_itemsize, w_itemsize):
    """Derive a per-generation VMEM budget from the actual block sizes."""
    blocks = (
        2 * Np * Np * lap_itemsize        # laplacian (double-buffered)
        + 2 * Np * TTC * x_itemsize       # x block
        + 2 * K * TTC * TTF * w_itemsize  # block-diagonal weights
        + 2 * TTF * w_itemsize            # bias
        + 2 * Np * TTF * x_itemsize       # output block
        + Np * TTF * 4                    # explicit f32 accumulator scratch
        + 4 * Np * max(TTC, TTF) * 4      # f32 matmul/combine intermediates
    )
    needed = int(blocks * 1.5) + (8 << 20)  # Mosaic internal scratch headroom
    try:
        phys = pltpu.get_tpu_info().vmem_capacity_bytes
    except Exception:
        phys = 64 << 20                     # v7x worst case per TensorCore
    return max(min(needed, int(phys * 0.85)), 16 << 20)


def chebnet_conv(x, laplacian, weight, bias, *, K):
    """x: (B, T, N, C), laplacian: (B, N, N), weight: (F_out, K*C), bias: (F_out,)."""
    B, T, N, C = x.shape
    F_out = weight.shape[0]
    assert weight.shape == (F_out, K * C)
    assert laplacian.shape == (B, N, N)

    # --- tile / padding selection -------------------------------------------
    TT = _choose_tt(T, C, F_out)
    Tp = _round_up(T, TT)          # pad time to a multiple of the time block
    Tb = Tp // TT
    Np = _round_up(N, 128)         # pad nodes to full MXU tiles
    TTC = TT * C
    TTF = TT * F_out

    # Zero-padding is exact for the Chebyshev recurrence (zero rows/cols of L
    # and zero rows of x contribute nothing to the real rows); padded rows /
    # timesteps only pick up the bias and are sliced off below.
    x_p = x
    if Tp != T or Np != N:
        x_p = jnp.pad(x, ((0, 0), (0, Tp - T), (0, Np - N), (0, 0)))
    lap_p = laplacian
    if Np != N:
        lap_p = jnp.pad(laplacian, ((0, 0), (0, Np - N), (0, Np - N)))

    # (B,Tp,Np,C) -> (B,Np,Tp*C): propagation becomes one wide matmul per tile.
    # TODO(synk): for v5e-class HBM bandwidth, consider moving this permute
    # upstream into the data pipeline (it is one extra HBM pass over x).
    x_wide = jnp.transpose(x_p, (0, 2, 1, 3)).reshape(B, Np, Tp * C)

    # Per-order weights (K, C, F), expanded block-diagonally over the TT
    # timesteps of ONE block only (no T^2 blow-up):
    #   w_blk[k, t*C + c, t*F + f] = weight[f, k*C + c]
    w_kcf = weight.reshape(F_out, K, C).transpose(1, 2, 0)       # (K, C, F)
    eye_tt = jnp.eye(TT, dtype=weight.dtype)
    w_blk = jnp.einsum('ts,kcf->ktcsf', eye_tt, w_kcf).reshape(K, TTC, TTF)

    # Bias tiled over the TT timesteps of a block.
    b_wide = jnp.tile(bias, TT).reshape(1, TTF)

    kernel = functools.partial(_cheb_kernel, K=K)

    x_isz = jnp.dtype(x.dtype).itemsize
    lap_isz = jnp.dtype(laplacian.dtype).itemsize
    w_isz = jnp.dtype(weight.dtype).itemsize
    vmem_limit = _vmem_limit_bytes(Np, TTC, TTF, K, x_isz, lap_isz, w_isz)

    flops = B * Tb * (2 * max(K - 1, 0) * Np * Np * TTC
                      + 2 * K * Np * TTC * TTF)
    bytes_accessed = int(
        B * Np * Np * lap_isz            # laplacian (once per batch)
        + B * Np * Tp * C * x_isz        # x
        + K * TTC * TTF * w_isz          # weights (resident)
        + TTF * w_isz                    # bias
        + B * Np * Tp * F_out * x_isz)   # out

    out_wide = pl.pallas_call(
        kernel,
        out_shape=jax.ShapeDtypeStruct((B, Np, Tp * F_out), x.dtype),
        grid_spec=pltpu.PrefetchScalarGridSpec(
            num_scalar_prefetch=0,
            grid=(B, Tb),
            in_specs=[
                # laplacian: one (Np, Np) slab per batch; index ignores the
                # time-block axis so it stays resident across the t loop.
                pl.BlockSpec((None, Np, Np), lambda b, t: (b, 0, 0)),
                # x: one (Np, TT*C) slab per (batch, time-block).
                pl.BlockSpec((None, Np, TTC), lambda b, t: (b, 0, t)),
                # weights / bias: same block every grid point (stay resident).
                pl.BlockSpec((K, TTC, TTF), lambda b, t: (0, 0, 0)),
                pl.BlockSpec((1, TTF), lambda b, t: (0, 0)),
            ],
            out_specs=pl.BlockSpec((None, Np, TTF), lambda b, t: (b, 0, t)),
            scratch_shapes=[pltpu.VMEM((Np, TTF), jnp.float32)],
        ),
        compiler_params=pltpu.CompilerParams(
            dimension_semantics=("parallel", "parallel"),
            vmem_limit_bytes=vmem_limit,
        ),
        cost_estimate=pl.CostEstimate(
            flops=flops, transcendentals=0, bytes_accessed=bytes_accessed),
    )(lap_p, x_wide, w_blk, b_wide)

    # (B, Np, Tp*F) -> (B, Tp, Np, F) -> slice the padding off.
    out = jnp.transpose(out_wide.reshape(B, Np, Tp, F_out), (0, 2, 1, 3))
    return out[:, :T, :N, :]


def chebnet_conv_ref(x, laplacian, weight, bias, *, K):
    """Pure-JAX reference mirroring the PyTorch forward."""
    cheb_x = x
    x0 = x
    if K > 1:
        x1 = jnp.einsum('bnm,btmc->btnc', laplacian, x0)
        cheb_x = jnp.concatenate((cheb_x, x1), -1)
        for _ in range(2, K):
            x2 = 2.0 * jnp.einsum('bnm,btmc->btnc', laplacian, x1) - x0
            cheb_x = jnp.concatenate((cheb_x, x2), -1)
            x0, x1 = x1, x2
    return jnp.einsum('btnk,fk->btnf', cheb_x, weight) + bias


if __name__ == "__main__":
    # Small deterministic example shapes (exercises the multi-time-block path:
    # TT = 16 -> 2 time blocks; N = 16 is padded to 128 inside the wrapper).
    B, T, N, C = 2, 32, 16, 16      # batch, time, nodes, in_features
    K = 3                           # Chebyshev order
    F_out = 16                      # out_features

    key = jax.random.PRNGKey(0)
    kx, kl, kw, kb = jax.random.split(key, 4)

    x = jax.random.normal(kx, (B, T, N, C), dtype=jnp.float32)
    # Symmetric, scaled "laplacian"-like matrix per batch.
    a = jax.random.normal(kl, (B, N, N), dtype=jnp.float32)
    laplacian = 0.1 * (a + jnp.swapaxes(a, -1, -2))

    # nn.Linear(in_features * k, out_features) parameter shapes.
    weight = 0.1 * jax.random.normal(kw, (F_out, C * K), dtype=jnp.float32)
    bias = 0.1 * jax.random.normal(kb, (F_out,), dtype=jnp.float32)

    out = chebnet_conv(x, laplacian, weight, bias, K=K)
    out = jax.block_until_ready(out)

    ref = chebnet_conv_ref(x, laplacian, weight, bias, K=K)
    assert out.shape == (B, T, N, F_out)
    assert jnp.allclose(out, ref, atol=1e-4, rtol=1e-4), (
        f"max abs diff {jnp.max(jnp.abs(out - ref))}")

    print("KERNEL_OK")
</pallas_src>

<mosaic_0001>
module attributes {stable_mosaic.version = 11 : i64} {
  func.func @_cheb_kernel(%arg0: i32, %arg1: i32, %arg2: memref<1x128x128xf32, #tpu.memory_space<vmem>>, %arg3: memref<1x128x256xf32, #tpu.memory_space<vmem>>, %arg4: memref<3x256x256xf32, #tpu.memory_space<vmem>>, %arg5: memref<1x256xf32, #tpu.memory_space<vmem>>, %arg6: memref<1x128x256xf32, #tpu.memory_space<vmem>>, %arg7: memref<128x256xf32, #tpu.memory_space<vmem>>) attributes {dimension_semantics = [#tpu.dimension_semantics<parallel>, #tpu.dimension_semantics<parallel>], iteration_bounds = array<i64: 2, 2>, scalar_prefetch = 0 : i64, scratch_operands = 1 : i64, tpu.core_type = #tpu.core_type<tc>, window_params = [{transform_indices = @transform_0, window_bounds = array<i64: 1, 128, 128>}, {transform_indices = @transform_1, window_bounds = array<i64: 1, 128, 256>}, {pipeline_mode = #tpu.pipeline_mode<synchronous>, transform_indices = @transform_2, window_bounds = array<i64: 3, 256, 256>}, {pipeline_mode = #tpu.pipeline_mode<synchronous>, transform_indices = @transform_3, window_bounds = array<i64: 1, 256>}, {transform_indices = @transform_4, window_bounds = array<i64: 1, 128, 256>}]} {
    %c0 = arith.constant 0 : index
    %c0_0 = arith.constant 0 : index
    %c0_1 = arith.constant 0 : index
    %0 = vector.load %arg3[%c0, %c0_0, %c0_1] : memref<1x128x256xf32, #tpu.memory_space<vmem>>, vector<1x128x256xf32>
    %1 = vector.shape_cast %0 : vector<1x128x256xf32> to vector<128x256xf32>
    %c0_2 = arith.constant 0 : index
    %c0_3 = arith.constant 0 : index
    %c0_4 = arith.constant 0 : index
    %2 = vector.load %arg4[%c0_2, %c0_3, %c0_4] : memref<3x256x256xf32, #tpu.memory_space<vmem>>, vector<1x256x256xf32>
    %3 = vector.shape_cast %2 : vector<1x256x256xf32> to vector<256x256xf32>
    %cst = arith.constant dense<0.000000e+00> : vector<128x256xf32>
    %4 = tpu.matmul %1, %3, %cst {dimension_numbers = #tpu.dot_dimension_numbers<[1], [0], [0], [1], [0, 0, 1, 1], [], []>} : vector<128x256xf32>, vector<256x256xf32>, vector<128x256xf32> -> vector<128x256xf32>
    %c0_5 = arith.constant 0 : index
    %c0_6 = arith.constant 0 : index
    %5 = vector.load %arg7[%c0_5, %c0_6] : memref<128x256xf32, #tpu.memory_space<vmem>>, vector<128x256xf32>
    tpu.vector_store %arg7[%c0_5, %c0_6], %4 {strides = array<i32>} : memref<128x256xf32, #tpu.memory_space<vmem>>, vector<128x256xf32>,
    %c0_7 = arith.constant 0 : index
    %c0_8 = arith.constant 0 : index
    %6 = vector.load %arg7[%c0_7, %c0_8] : memref<128x256xf32, #tpu.memory_space<vmem>>, vector<128x256xf32>
    %c0_9 = arith.constant 0 : index
    %c0_10 = arith.constant 0 : index
    %7 = vector.load %arg5[%c0_9, %c0_10] : memref<1x256xf32, #tpu.memory_space<vmem>>, vector<1x256xf32>
    %8 = vector.broadcast %7 : vector<1x256xf32> to vector<128x256xf32>
    %9 = arith.addf %6, %8 : vector<128x256xf32>
    %c0_11 = arith.constant 0 : index
    %c0_12 = arith.constant 0 : index
    %10 = vector.load %arg7[%c0_11, %c0_12] : memref<128x256xf32, #tpu.memory_space<vmem>>, vector<128x256xf32>
    tpu.vector_store %arg7[%c0_11, %c0_12], %9 {strides = array<i32>} : memref<128x256xf32, #tpu.memory_space<vmem>>, vector<128x256xf32>,
    %c0_13 = arith.constant 0 : index
    %c0_14 = arith.constant 0 : index
    %c0_15 = arith.constant 0 : index
    %11 = vector.load %arg2[%c0_13, %c0_14, %c0_15] : memref<1x128x128xf32, #tpu.memory_space<vmem>>, vector<1x128x128xf32>
    %12 = vector.shape_cast %11 : vector<1x128x128xf32> to vector<128x128xf32>
    %cst_16 = arith.constant dense<0.000000e+00> : vector<128x256xf32>
    %13 = tpu.matmul %12, %1, %cst_16 {dimension_numbers = #tpu.dot_dimension_numbers<[1], [0], [0], [1], [0, 0, 1, 1], [], []>} : vector<128x128xf32>, vector<128x256xf32>, vector<128x256xf32> -> vector<128x256xf32>
    %c0_17 = arith.constant 0 : index
    %c0_18 = arith.constant 0 : index
    %14 = vector.load %arg7[%c0_17, %c0_18] : memref<128x256xf32, #tpu.memory_space<vmem>>, vector<128x256xf32>
    %c1 = arith.constant 1 : index
    %c0_19 = arith.constant 0 : index
    %c0_20 = arith.constant 0 : index
    %15 = vector.load %arg4[%c1, %c0_19, %c0_20] : memref<3x256x256xf32, #tpu.memory_space<vmem>>, vector<1x256x256xf32>
    %16 = vector.shape_cast %15 : vector<1x256x256xf32> to vector<256x256xf32>
    %cst_21 = arith.constant dense<0.000000e+00> : vector<128x256xf32>
    %17 = tpu.matmul %13, %16, %cst_21 {dimension_numbers = #tpu.dot_dimension_numbers<[1], [0], [0], [1], [0, 0, 1, 1], [], []>} : vector<128x256xf32>, vector<256x256xf32>, vector<128x256xf32> -> vector<128x256xf32>
    %18 = arith.addf %14, %17 : vector<128x256xf32>
    %c0_22 = arith.constant 0 : index
    %c0_23 = arith.constant 0 : index
    %19 = vector.load %arg7[%c0_22, %c0_23] : memref<128x256xf32, #tpu.memory_space<vmem>>, vector<128x256xf32>
    tpu.vector_store %arg7[%c0_22, %c0_23], %18 {strides = array<i32>} : memref<128x256xf32, #tpu.memory_space<vmem>>, vector<128x256xf32>,
    %cst_24 = arith.constant dense<0.000000e+00> : vector<128x256xf32>
    %20 = tpu.matmul %12, %13, %cst_24 {dimension_numbers = #tpu.dot_dimension_numbers<[1], [0], [0], [1], [0, 0, 1, 1], [], []>} : vector<128x128xf32>, vector<128x256xf32>, vector<128x256xf32> -> vector<128x256xf32>
    %cst_25 = arith.constant 2.000000e+00 : f32
    %21 = vector.broadcast %cst_25 : f32 to vector<128x256xf32>
    %22 = arith.mulf %21, %20 : vector<128x256xf32>
    %23 = arith.subf %22, %1 : vector<128x256xf32>
    %c0_26 = arith.constant 0 : index
    %c0_27 = arith.constant 0 : index
    %24 = vector.load %arg7[%c0_26, %c0_27] : memref<128x256xf32, #tpu.memory_space<vmem>>, vector<128x256xf32>
    %c2 = arith.constant 2 : index
    %c0_28 = arith.constant 0 : index
    %c0_29 = arith.constant 0 : index
    %25 = vector.load %arg4[%c2, %c0_28, %c0_29] : memref<3x256x256xf32, #tpu.memory_space<vmem>>, vector<1x256x256xf32>
    %26 = vector.shape_cast %25 : vector<1x256x256xf32> to vector<256x256xf32>
    %cst_30 = arith.constant dense<0.000000e+00> : vector<128x256xf32>
    %27 = tpu.matmul %23, %26, %cst_30 {dimension_numbers = #tpu.dot_dimension_numbers<[1], [0], [0], [1], [0, 0, 1, 1], [], []>} : vector<128x256xf32>, vector<256x256xf32>, vector<128x256xf32> -> vector<128x256xf32>
    %28 = arith.addf %24, %27 : vector<128x256xf32>
    %c0_31 = arith.constant 0 : index
    %c0_32 = arith.constant 0 : index
    %29 = vector.load %arg7[%c0_31, %c0_32] : memref<128x256xf32, #tpu.memory_space<vmem>>, vector<128x256xf32>
    tpu.vector_store %arg7[%c0_31, %c0_32], %28 {strides = array<i32>} : memref<128x256xf32, #tpu.memory_space<vmem>>, vector<128x256xf32>,
    %c0_33 = arith.constant 0 : index
    %c0_34 = arith.constant 0 : index
    %30 = vector.load %arg7[%c0_33, %c0_34] : memref<128x256xf32, #tpu.memory_space<vmem>>, vector<128x256xf32>
    %c0_35 = arith.constant 0 : index
    %c0_36 = arith.constant 0 : index
    %c0_37 = arith.constant 0 : index
    %31 = vector.load %arg6[%c0_35, %c0_36, %c0_37] : memref<1x128x256xf32, #tpu.memory_space<vmem>>, vector<1x128x256xf32>
    %32 = vector.shape_cast %31 : vector<1x128x256xf32> to vector<128x256xf32>
    %33 = vector.shape_cast %30 : vector<128x256xf32> to vector<1x128x256xf32>
    tpu.vector_store %arg6[%c0_35, %c0_36, %c0_37], %33 {strides = array<i32>} : memref<1x128x256xf32, #tpu.memory_space<vmem>>, vector<1x128x256xf32>,
    return
  }
  func.func @transform_0(%arg0: i32, %arg1: i32) -> (i32, i32, i32) {
    %c0_i32 = arith.constant 0 : i32
    %c0_i32_0 = arith.constant 0 : i32
    %c0_i32_1 = arith.constant 0 : i32
    return %arg0, %c0_i32, %c0_i32_0 : i32, i32, i32
  }
  func.func @transform_1(%arg0: i32, %arg1: i32) -> (i32, i32, i32) {
    %c0_i32 = arith.constant 0 : i32
    %c0_i32_0 = arith.constant 0 : i32
    return %arg0, %c0_i32, %arg1 : i32, i32, i32
  }
  func.func @transform_2(%arg0: i32, %arg1: i32) -> (i32, i32, i32) {
    %c0_i32 = arith.constant 0 : i32
    %c0_i32_0 = arith.constant 0 : i32
    %c0_i32_1 = arith.constant 0 : i32
    %c0_i32_2 = arith.constant 0 : i32
    return %c0_i32, %c0_i32_0, %c0_i32_1 : i32, i32, i32
  }
  func.func @transform_3(%arg0: i32, %arg1: i32) -> (i32, i32) {
    %c0_i32 = arith.constant 0 : i32
    %c0_i32_0 = arith.constant 0 : i32
    %c0_i32_1 = arith.constant 0 : i32
    return %c0_i32, %c0_i32_0 : i32, i32
  }
  func.func @transform_4(%arg0: i32, %arg1: i32) -> (i32, i32, i32) {
    %c0_i32 = arith.constant 0 : i32
    %c0_i32_0 = arith.constant 0 : i32
    return %arg0, %c0_i32, %arg1 : i32, i32, i32
  }
}

</mosaic_0001>

<bundles_post_ra>
// kernel: tpu_custom_call.1
= control target key start
LH: loop header
LB: loop body
LE: loop exit
PB: predicated region body
PF: predicated region fallthrough
CT: control target
= control target key end

     0   :  { %s3721_s0 = inlined_call_operand.hbm [shape: f32[2,128,128], index: 0, kind: input, shape index: {}]   ;;  %s3722_s1 = inlined_call_operand.hbm [shape: f32[2,128,512], index: 1, kind: input, shape index: {}]   ;;  %s3723_s2 = inlined_call_operand.hbm [shape: f32[3,256,256], index: 2, kind: input, shape index: {}]   ;;  %s3724_s3 = inlined_call_operand.vmem [shape: f32[1,256], index: 3, kind: input, shape index: {}]   ;;  %s3725_s4 = inlined_call_operand.hbm [shape: f32[2,128,512], index: 4, kind: output, shape index: {}]  }
   0x1   :  { %3736 = sst [smem:[#allocation93_spill]] %s3721_s0 }
   0x2   :  { %3737 = sst [smem:[#allocation94_spill]] %s3723_s2 }
   0x3   :  { %9 = vsyncpa [#allocation4], 0 }
   0x4   :  { %11 = vsyncpa [#allocation4 + $0x1], 0 }
   0x5   :  { %12 = vsyncpa [#allocation7], 0 }
   0x6   :  { %14 = vsyncpa [#allocation7 + $0x1], 0 }
   0x7   :  { %15 = vsyncpa [#allocation5], 0 }
   0x8   :  { %17 = vsyncpa [#allocation5 + $0x1], 0  ;;  %s2610_s15 = smov 0   ;;  %s2612_s16 = smov 0  }
   0x9   :  { %s2614_s17 = smov 0   ;;  %s2616_s18 = smov 0  }
   0xa   :  { %s2618_s19 = smov 0   ;;  %s2620_s20 = smov 0  }
   0xb   :  { %s2622_s21 = smov 0   ;;  %s2624_s22 = smov 0  }
   0xc   :  { %s2626_s23 = smov 0   ;;  %s2628_s24 = smov 0  }
   0xd   :  { %s2630_s25 = smov 0  }
   0xe LB: > { %3738 = sst [smem:[#allocation14_spill]] %s2534_s15  ;;  %s2666_s26 = sadd.s32 4294967295, %s2574_s25   ;;  %s2574_s25 = sphi %s2630_s25, %s23_s25   ;;  %s2570_s24 = sphi %s2628_s24, %s3913_s24   ;;  %s2566_s23 = sphi %s2626_s23, %s3912_s23   ;;  %s2562_s22 = sphi %s2624_s22, %s3911_s22   ;;  %s2558_s21 = sphi %s2622_s21, %s3910_s21   ;;  %s2554_s20 = sphi %s2620_s20, %s3903_s20   ;;  %s2550_s19 = sphi %s2618_s19, %s3909_s19   ;;  %s2546_s18 = sphi %s2616_s18, %s3908_s18   ;;  %s2542_s17 = sphi %s2614_s17, %s3901_s17   ;;  %s2538_s16 = sphi %s2612_s16, %s3907_s16   ;;  %s2534_s15 = sphi %s2610_s15, %s3906_s15  }
   0xf   : > { %3739 = sst [smem:[#allocation15_spill]] %s2542_s17  ;;  %s2173_s27 = sadd.s32 4294967294, %s2574_s25  }
  0x10   : > { %3740 = sst [smem:[#allocation16_spill]] %s2554_s20  ;;  %p56_p0 = scmp.eq.s32.totalorder %s2666_s26, 0 }
  0x11   : > { %p83_p1 = scmp.ne.s32.totalorder %s2538_s16, %s2534_s15  ;;  %p151_p2 = scmp.eq.s32.totalorder %s2666_s26, 3 }
  0x12   : > { %p157_p3 = scmp.eq.s32.totalorder %s2173_s27, 3  ;;  %p2174_p5 = scmp.ge.s32.totalorder %s2574_s25, 1 }
  0x13   : > { %p2675_p4 = por %p83_p1, %p56_p0  ;;  %p164_p7 = scmp.lt.s32.totalorder %s2574_s25, 5 }
  0x14   : > { %p2680_p6 = por %p157_p3, %p83_p1  ;;  %s3744_s2 = sld [smem:[#allocation94_spill]] }
  0x15   : > { %p2688_p8 = pnand %p2174_p5, %p164_p7  ;;  %s2576_s8 = smov [#allocation8]  }
  0x16   : > { %s3742_s29 = scalar_select %p2680_p6, 1, 0 }
  0x17   : > { %p2206_p9 = pneg %p2688_p8  ;;  %s177_s9 = sshll.u32 %s2576_s8, 4  ;;  %s178_s9 = int_to_ptr.vmem [resolvable:$true] %s177_s9 }
  0x18   : > { %3743 = sst [smem:[#allocation17_spill]] %s3742_s29  ;;  %s3726_s10 = smov 256  }
  0x19   : > { %p2207_p10 = pnand %p2206_p9, %p56_p0  ;;  %s3727_s11 = smov 16  }
  0x1a   : > { %s175_s6 = sshll.u32 %s3744_s2, 4  ;;  %s32_s12 = sadd.s32 1, %s2566_s23  ;;  %s176_s6 = int_to_ptr.hbm [resolvable:$true] %s175_s6 }
  0x1b   : > { %2209 = dma.hbm_to_vmem [thread:$0]  (!%p2207_p10), %s176_s6, 24576, %s178_s9, [#allocation7], %s3726_s10, %s3726_s10, %s3727_s11  }
  0x1c   : > { %p33_p11 = scmp.ge.s32.totalorder %s32_s12, 2  ;;  %s35_s13 = sadd.s32 1, %s2570_s24 }
  0x1d   : > { %s42_s14 = sadd.s32 1, %s2554_s20  ;;  %p49_p12 = scmp.ne.s32.totalorder %s2554_s20, %s2550_s19 }
  0x1e   : > { %s3915_s12 = smov (%p33_p11, %s32_s12), 0  ;;  %s3917_s13 = smov (!%p33_p11, %s35_s13), %s2570_s24 }
  0x1f   : > { %3746 = sst [smem:[#allocation18_spill]] %s3915_s12  ;;  %p50_p13 = scmp.eq.s32.totalorder %s2574_s25, 0 }
  0x20   : > { %p55_p1 = scmp.ne.s32.totalorder %s2550_s19, %s2546_s18  ;;  %p37_p3 = scmp.ge.s32.totalorder %s3917_s13, 2 }
  0x21   : > { %s66_s27 = ssub.s32 %s2566_s23, %s3915_s12  ;;  %p2714_p5 = por %p50_p13, %p49_p12 }
  0x22   : > { %p2720_p7 = por %p56_p0, %p55_p1  ;;  %s3919_s13 = smov (%p37_p3, %s3917_s13), 0 }
  0x23   : > { %3749 = sst [smem:[#allocation19_spill]] %s3919_s13  ;;  %p2222_p9 = scmp.lt.s32.totalorder %s2574_s25, 4 }
  0x24   : > { %s194_s6 = sand.u32 1, %s2554_s20   ;;  %s39_s18 = ssub.s32 %s2570_s24, %s3919_s13 }
  0x25   : > { %p40_p10 = scmp.eq.s32.totalorder %s39_s18, 0  ;;  %s67_s8 = sor.u32 %s66_s27, %s39_s18 }
  0x26   : > { %p68_p11 = scmp.eq.s32.totalorder %s67_s8, 0  ;;  %s2177_s9 = sshll.u32 %s194_s6, 7 }
  0x27   : > { %s2731_s10 = scalar_select %p40_p10, %s2554_s20, %s42_s14  }
  0x28   : > { %s2195_s11 = sshll.u32 %s2570_s24, 7  ;;  %s3751_s0 = sld [smem:[#allocation93_spill]] }
  0x29   : > { %3750 = sst [smem:[#allocation20_spill]] %s2731_s10  ;;  %s198_s15 = scalar_lea.vmem [#allocation3], %s2177_s9 }
  0x2a   : > { %s206_s13 = sshll.u32 %s198_s15, 4  ;;  %p2211_p12 = pnand %p2222_p9, %p2714_p5  ;;  %s207_s13 = int_to_ptr.vmem [resolvable:$true] %s206_s13 }
  0x2b   : > { %s195_s14 = scalar_lea.sflag [#allocation4], %s194_s6  ;;  %s2579_s18 = smov 128  }
  0x2c   : > { %s2580_s10 = smov 8   ;;  %s216_s20 = sand.u32 1, %s2574_s25  }
  0x2d   : > { %s70_s2 = sadd.s32 1, %s2542_s17  ;;  %p77_p1 = scmp.ne.s32.totalorder %s2542_s17, %s2538_s16 }
  0x2e   : > { %s203_s29 = scalar_lea.hbm %s3751_s0, %s2195_s11  ;;  %s2181_s30 = sshll.u32 %s2566_s23, 1 }
  0x2f   : > { %s204_s27 = sshll.u32 %s203_s29, 4  ;;  %p79_p3 = por %p77_p1, %p50_p13  ;;  %s205_s27 = int_to_ptr.hbm [resolvable:$true] %s204_s27 }
  0x30   : > { %2213 = dma.hbm_to_vmem [thread:$0]  (!%p2211_p12), %s205_s27, 2048, %s207_s13, %s195_s14, %s2579_s18, %s2579_s18, %s2580_s10  }
  0x31   : > { %s2747_s11 = scalar_select %p68_p11, %s2542_s17, %s70_s2  }
  0x32   : > { %p2753_p10 = por %p151_p2, %p77_p1  ;;  %s218_s29 = sand.u32 1, %s2542_s17  }
  0x33   : > { %3752 = sst [smem:[#allocation21_spill]] %s2747_s11  ;;  %s2180_s12 = sshll.u32 %s218_s29, 8 }
  0x34   : > { %s3753_s15 = scalar_select %p2753_p10, 1, 0 }
  0x35   : > { %s2182_s6 = sshll.u32 %s2570_s24, 6  ;;  %s220_s10 = scalar_lea.vmem [#allocation6], %s2180_s12 }
  0x36   : > { %3754 = sst [smem:[#allocation22_spill]] %s3753_s15  ;;  %s225_s9 = sadd.s32 %s2182_s6, %s2181_s30 }
  0x37   : > { %s230_s13 = sshll.u32 %s220_s10, 4  ;;  %s2183_s27 = sshll.u32 %s225_s9, 3  ;;  %s231_s13 = int_to_ptr.vmem [resolvable:$true] %s230_s13 }
  0x38   : > { %s227_s18 = scalar_lea.hbm %s3722_s1, %s2183_s27  ;;  %p2214_p13 = pnand %p2222_p9, %p79_p3 }
  0x39   : > { %s228_s2 = sshll.u32 %s227_s18, 4  ;;  %s217_s0 = scalar_lea.sflag [#allocation7], %s216_s20  ;;  %s229_s2 = int_to_ptr.hbm [resolvable:$true] %s228_s2 }
  0x3a   : > { %s2581_s11 = smov 512   ;;  %s3755_s15 = smov 16  }
  0x3b   : > { %s3756_s17 = smov 256   ;;  %242 = sbr.rel (%p2688_p8) target bundleno = 910 (0x38e), region = 36 }
  0x3c   : > { %2216 = dma.hbm_to_vmem [thread:$0]  (!%p2214_p13), %s229_s2, 4096, %s231_s13, %s217_s0, %s2581_s11, %s3756_s17, %s3755_s15  }
  0x40   : > { %s244_s29 = sand.u32 1, %s2550_s19  }
  0x41   : > { %s2185_s12 = sshll.u32 %s244_s29, 7  ;;  %s245_s30 = scalar_lea.sflag [#allocation4], %s244_s29 }
  0x42   : > { %s2770_s6 = scalar_lea.vmem [#allocation3], %s2185_s12 }
  0x43   : > { %2517 = dma.done.wait (%p2720_p7), %s245_s30, 2048  }
  0x44   : > { %2519 = vsyncadd (%p2720_p7), %s245_s30, 4294965248  ;;  %s254_s0 = sand.u32 1, %s2666_s26   ;;  %s256_s17 = sand.u32 1, %s2538_s16  }
  0x45   : > { %s2780_s20 = sshll.u32 %s256_s17, 8  ;;  %s255_s7 = scalar_lea.sflag [#allocation7], %s254_s0 }
  0x46   : > { %s2783_s11 = scalar_lea.vmem [#allocation6], %s2780_s20 }
  0x47   : > { %2521 = dma.done.wait (%p2675_p4), %s255_s7, 4096  }
  0x48   : > { %2523 = vsyncadd (%p2675_p4), %s255_s7, 4294963200 }
  0x49   : > { %2525 = dma.done.wait (%p56_p0), [#allocation7], 24576  }
  0x4a   : > { %2527 = vsyncadd (%p56_p0), [#allocation7], 4294942720  ;;  %v358_v0 = vld [vmem:[#allocation8 + $0xf0] sm:$0xff]  ;;  %v356_v2 = vld [vmem:[#allocation8 + $0xe0] sm:$0xff]  ;;  %s3492_s5 = scalar_lea.vmem [#allocation9], %s2780_s20  ;;  %s2190_s15 = sshll.u32 %s2558_s21, 1 }
  0x4b   : > { %v390_v1 = vld [vmem:[#allocation8 + $0x1f0] sm:$0xff]  ;;  %392 = vmatpush.msra.mxu0 %v358_v0  ;;  %v388_v3 = vld [vmem:[#allocation8 + $0x1e0] sm:$0xff]  ;;  %v2797_v33 = vld [vmem:[%s2783_s11 + $0x8] sm:$0xff]  ;;  %s2191_s9 = sshll.u32 %s2562_s22, 6  ;;  %s2047_s14 = sshll.u32 %s3492_s5, 4  ;;  %s2048_s14 = int_to_ptr.vmem [resolvable:$true] %s2047_s14 }
  0x4c   : > { %457 = vmatpush.msra.mxu1 %v390_v1  ;;  %v354_v4 = vld [vmem:[#allocation8 + $0xd0] sm:$0xff]  ;;  %v352_v6 = vld [vmem:[#allocation8 + $0xc0] sm:$0xff]  ;;  %v2805_v35 = vld [vmem:[%s2783_s11 + $0x18] sm:$0xff]  ;;  %s2044_s10 = sadd.s32 %s2191_s9, %s2190_s15  ;;  %s2033_s2 = scalar_lea.sflag [#allocation5], %s256_s17 }
  0x4d   : > { %v386_v5 = vld [vmem:[#allocation8 + $0x1d0] sm:$0xff]  ;;  %393 = vmatpush.msra.mxu0 %v356_v2  ;;  %v384_v7 = vld [vmem:[#allocation8 + $0x1c0] sm:$0xff]  ;;  %v2813_v37 = vld [vmem:[%s2783_s11 + $0x28] sm:$0xff]  ;;  %s2192_s21 = sshll.u32 %s2044_s10, 3  ;;  %s2464_s0 = scalar_lea.hbm %s3725_s4, 1024 }
  0x4e   : > { %458 = vmatpush.msra.mxu1 %v388_v3  ;;  %v350_v8 = vld [vmem:[#allocation8 + $0xb0] sm:$0xff]  ;;  %v348_v10 = vld [vmem:[#allocation8 + $0xa0] sm:$0xff]  ;;  %v2821_v39 = vld [vmem:[%s2783_s11 + $0x38] sm:$0xff]  ;;  %s2046_s27 = scalar_lea.hbm %s3725_s4, %s2192_s21 }
  0x4f   : > { %394 = vmatpush.msra.mxu0 %v354_v4  ;;  %v382_v9 = vld [vmem:[#allocation8 + $0x1b0] sm:$0xff]  ;;  %v380_v11 = vld [vmem:[#allocation8 + $0x1a0] sm:$0xff]  ;;  %v2829_v41 = vld [vmem:[%s2783_s11 + $0x48] sm:$0xff]  ;;  %s2049_s18 = sshll.u32 %s2046_s27, 4  ;;  %s2050_s18 = int_to_ptr.hbm [resolvable:$true] %s2049_s18 }
  0x50   : > { %459 = vmatpush.msra.mxu1 %v386_v5  ;;  %v346_v12 = vld [vmem:[#allocation8 + $0x90] sm:$0xff]  ;;  %v344_v14 = vld [vmem:[#allocation8 + $0x80] sm:$0xff]  ;;  %v2837_v43 = vld [vmem:[%s2783_s11 + $0x58] sm:$0xff]  ;;  %s2458_s29 = sshra.s32 %s2050_s18, 4  ;;  %s2459_s29 = int_to_ptr.hbm [resolvable:$true] %s2458_s29 }
  0x51   : > { %395 = vmatpush.msra.mxu0 %v352_v6  ;;  %v378_v13 = vld [vmem:[#allocation8 + $0x190] sm:$0xff]  ;;  %v376_v15 = vld [vmem:[#allocation8 + $0x180] sm:$0xff]  ;;  %v2845_v45 = vld [vmem:[%s2783_s11 + $0x68] sm:$0xff]  ;;  %s2460_s12 = scalar_lea.hbm %s2459_s29, 256  ;;  %p2465_p8 = scmp.lt.s32.totalorder %s2459_s29, %s3725_s4 }
  0x52   : > { %460 = vmatpush.msra.mxu1 %v384_v7  ;;  %v342_v16 = vld [vmem:[#allocation8 + $0x70] sm:$0xff]  ;;  %v340_v18 = vld [vmem:[#allocation8 + $0x60] sm:$0xff]  ;;  %v2853_v47 = vld [vmem:[%s2783_s11 + $0x78] sm:$0xff]  ;;  %p2461_p0 = scmp.ne.s32.totalorder %s2459_s29, %s2460_s12  ;;  %p2466_p5 = scmp.lt.s32.totalorder %s2464_s0, %s2460_s12 }
  0x53   : > { %396 = vmatpush.msra.mxu0 %v350_v8  ;;  %v374_v17 = vld [vmem:[#allocation8 + $0x170] sm:$0xff]  ;;  %v372_v19 = vld [vmem:[#allocation8 + $0x160] sm:$0xff]  ;;  %v359_v48 = vld [vmem:[#allocation8 + $0xf8] sm:$0xff] }
  0x54   : > { %461 = vmatpush.msra.mxu1 %v382_v9  ;;  %v338_v20 = vld [vmem:[#allocation8 + $0x50] sm:$0xff]  ;;  %v336_v22 = vld [vmem:[#allocation8 + $0x40] sm:$0xff]  ;;  %v391_v49 = vld [vmem:[#allocation8 + $0x1f8] sm:$0xff]  ;;  %522 = vmatpush.msra.mxu2 %v359_v48  ;;  %p2462_p2 = pnand %p2461_p0, %p2753_p10  ;;  %p2467_p7 = por %p2466_p5, %p2465_p8 }
  0x55   : > { %397 = vmatpush.msra.mxu0 %v348_v10  ;;  %v370_v21 = vld [vmem:[#allocation8 + $0x150] sm:$0xff]  ;;  %v368_v23 = vld [vmem:[#allocation8 + $0x140] sm:$0xff]  ;;  %587 = vmatpush.msra.mxu3 %v391_v49  ;;  %v2861_v51 = vld [vmem:[%s2783_s11 + $0x88] sm:$0xff] }
  0x56   : > { %462 = vmatpush.msra.mxu1 %v380_v11  ;;  %v334_v24 = vld [vmem:[#allocation8 + $0x30] sm:$0xff]  ;;  %v332_v26 = vld [vmem:[#allocation8 + $0x20] sm:$0xff]  ;;  %v357_v52 = vld [vmem:[#allocation8 + $0xe8] sm:$0xff]  ;;  %p2463_p4 = pneg %p2462_p2 }
  0x57   : > { %398 = vmatpush.msra.mxu0 %v346_v12  ;;  %v366_v25 = vld [vmem:[#allocation8 + $0x130] sm:$0xff]  ;;  %v364_v27 = vld [vmem:[#allocation8 + $0x120] sm:$0xff]  ;;  %v389_v53 = vld [vmem:[#allocation8 + $0x1e8] sm:$0xff]  ;;  %523 = vmatpush.msra.mxu2 %v357_v52 }
  0x58   : > { %463 = vmatpush.msra.mxu1 %v378_v13  ;;  %v330_v28 = vld [vmem:[#allocation8 + $0x10] sm:$0xff]  ;;  %v328_v30 = vld [vmem:[#allocation8] sm:$0xff]  ;;  %588 = vmatpush.msra.mxu3 %v389_v53  ;;  %v2869_v55 = vld [vmem:[%s2783_s11 + $0xf8] sm:$0xff]  ;;  %p2468_p9 = pnand %p2467_p7, %p2463_p4 }
  0x59   : > { %399 = vmatpush.msra.mxu0 %v344_v14  ;;  %v362_v29 = vld [vmem:[#allocation8 + $0x110] sm:$0xff]  ;;  %v360_v31 = vld [vmem:[#allocation8 + $0x100] sm:$0xff]  ;;  %v355_v56 = vld [vmem:[#allocation8 + $0xd8] sm:$0xff] }
  0x5a   : > { %464 = vmatpush.msra.mxu1 %v376_v15  ;;  %v2794_v32 = vld [vmem:[%s2783_s11] sm:$0xff]  ;;  %v2802_v34 = vld [vmem:[%s2783_s11 + $0x10] sm:$0xff]  ;;  %v387_v57 = vld [vmem:[#allocation8 + $0x1d8] sm:$0xff]  ;;  %524 = vmatpush.msra.mxu2 %v355_v56 }
  0x5b   : > { %400 = vmatpush.msra.mxu0 %v342_v16  ;;  %v2810_v36 = vld [vmem:[%s2783_s11 + $0x20] sm:$0xff]  ;;  %v2818_v38 = vld [vmem:[%s2783_s11 + $0x30] sm:$0xff]  ;;  %v2877_v59 = vld [vmem:[%s2783_s11 + $0xe8] sm:$0xff]  ;;  %589 = vmatpush.msra.mxu3 %v387_v57 }
  0x5c   : > { %465 = vmatpush.msra.mxu1 %v374_v17  ;;  %v2826_v40 = vld [vmem:[%s2783_s11 + $0x40] sm:$0xff]  ;;  %v2834_v42 = vld [vmem:[%s2783_s11 + $0x50] sm:$0xff]  ;;  %v353_v60 = vld [vmem:[#allocation8 + $0xc8] sm:$0xff] }
  0x5d   : > { %401 = vmatpush.msra.mxu0 %v340_v18  ;;  %v2842_v44 = vld [vmem:[%s2783_s11 + $0x60] sm:$0xff]  ;;  %v2850_v46 = vld [vmem:[%s2783_s11 + $0x70] sm:$0xff]  ;;  %v385_v61 = vld [vmem:[#allocation8 + $0x1c8] sm:$0xff]  ;;  %525 = vmatpush.msra.mxu2 %v353_v60 }
  0x5e   : > { %466 = vmatpush.msra.mxu1 %v372_v19  ;;  %v2858_v50 = vld [vmem:[%s2783_s11 + $0x80] sm:$0xff]  ;;  %v2866_v54 = vld [vmem:[%s2783_s11 + $0xf0] sm:$0xff]  ;;  %v2883_v63 = vld [vmem:[%s2783_s11 + $0xd8] sm:$0xff]  ;;  %590 = vmatpush.msra.mxu3 %v385_v61 }
  0x5f   : > { %402 = vmatpush.msra.mxu0 %v338_v20  ;;  %v2874_v58 = vld [vmem:[%s2783_s11 + $0xe0] sm:$0xff]  ;;  %v2880_v62 = vld [vmem:[%s2783_s11 + $0xd0] sm:$0xff]  ;;  %v351_v0 = vld [vmem:[#allocation8 + $0xb8] sm:$0xff] }
  0x60   : > { %467 = vmatpush.msra.mxu1 %v370_v21  ;;  %v383_v1 = vld [vmem:[#allocation8 + $0x1b8] sm:$0xff]  ;;  %v2888_v2 = vld [vmem:[%s2783_s11 + $0x90] sm:$0xff]  ;;  %v2896_v4 = vld [vmem:[%s2783_s11 + $0xc0] sm:$0xff]  ;;  %526 = vmatpush.msra.mxu2 %v351_v0 }
  0x61   : > { %403 = vmatpush.msra.mxu0 %v336_v22  ;;  %v2891_v3 = vld [vmem:[%s2783_s11 + $0x98] sm:$0xff]  ;;  %591 = vmatpush.msra.mxu3 %v383_v1  ;;  %v2901_v5 = vld [vmem:[%s2783_s11 + $0xc8] sm:$0xff]  ;;  %v2906_v10 = vld [vmem:[%s2783_s11 + $0xb0] sm:$0xff] }
  0x62   : > { %468 = vmatpush.msra.mxu1 %v368_v23  ;;  %v349_v6 = vld [vmem:[#allocation8 + $0xa8] sm:$0xff]  ;;  %v347_v8 = vld [vmem:[#allocation8 + $0x98] sm:$0xff]  ;;  %v2914_v14 = vld [vmem:[%s2783_s11 + $0xa0] sm:$0xff] }
  0x63   : > { %404 = vmatpush.msra.mxu0 %v334_v24  ;;  %v381_v7 = vld [vmem:[#allocation8 + $0x1a8] sm:$0xff]  ;;  %v379_v9 = vld [vmem:[#allocation8 + $0x198] sm:$0xff]  ;;  %527 = vmatpush.msra.mxu2 %v349_v6  ;;  %v3054_v0 = vld [vmem:[%s2770_s6 + $0x40] sm:$0xff] }
  0x64   : > { %469 = vmatpush.msra.mxu1 %v366_v25  ;;  %v2909_v11 = vld [vmem:[%s2783_s11 + $0xb8] sm:$0xff]  ;;  %592 = vmatpush.msra.mxu3 %v381_v7  ;;  %v345_v12 = vld [vmem:[#allocation8 + $0x88] sm:$0xff]  ;;  %v995_v1 = vld [vmem:[#allocation8 + $0x2f0] sm:$0xff] }
  0x65   : > { %405 = vmatpush.msra.mxu0 %v332_v26  ;;  %v377_v13 = vld [vmem:[#allocation8 + $0x188] sm:$0xff]  ;;  %528 = vmatpush.msra.mxu2 %v347_v8  ;;  %v343_v16 = vld [vmem:[#allocation8 + $0x78] sm:$0xff]  ;;  %v1025_v6 = vld [vmem:[#allocation8 + $0x3e0] sm:$0xff] }
  0x66   : > { %470 = vmatpush.msra.mxu1 %v364_v27  ;;  %v2917_v15 = vld [vmem:[%s2783_s11 + $0xa8] sm:$0xff]  ;;  %593 = vmatpush.msra.mxu3 %v379_v9  ;;  %v375_v17 = vld [vmem:[#allocation8 + $0x178] sm:$0xff]  ;;  %v991_v9 = vld [vmem:[#allocation8 + $0x2d0] sm:$0xff] }
  0x67   : > { %406 = vmatpush.msra.mxu0 %v330_v28  ;;  %529 = vmatpush.msra.mxu2 %v345_v12  ;;  %v341_v18 = vld [vmem:[#allocation8 + $0x68] sm:$0xff]  ;;  %v339_v20 = vld [vmem:[#allocation8 + $0x58] sm:$0xff] }
  0x68   : > { %471 = vmatpush.msra.mxu1 %v362_v29  ;;  %594 = vmatpush.msra.mxu3 %v377_v13  ;;  %v373_v19 = vld [vmem:[#allocation8 + $0x168] sm:$0xff]  ;;  %v371_v21 = vld [vmem:[#allocation8 + $0x158] sm:$0xff]  ;;  %v989_v13 = vld [vmem:[#allocation8 + $0x2c0] sm:$0xff] }
  0x69   : > { %407 = vmatpush.msra.mxu0 %v328_v30  ;;  %530 = vmatpush.msra.mxu2 %v343_v16  ;;  %v337_v22 = vld [vmem:[#allocation8 + $0x48] sm:$0xff]  ;;  %v335_v24 = vld [vmem:[#allocation8 + $0x38] sm:$0xff] }
  0x6a   : > { %472 = vmatpush.msra.mxu1 %v360_v31  ;;  %408 = vmatmul.f32.vlgmr.msra.gmra.mxu0 %v2794_v32  ;;  %v369_v23 = vld [vmem:[#allocation8 + $0x148] sm:$0xff]  ;;  %v367_v25 = vld [vmem:[#allocation8 + $0x138] sm:$0xff] }
  0x6b   : > { %473 = vmatmul.f32.vlgmr.msra.gmra.mxu1 %v2797_v33  ;;  %802 = vmatpush.msrb.mxu0 %v2866_v54  ;;  %v333_v26 = vld [vmem:[#allocation8 + $0x28] sm:$0xff]  ;;  %v331_v28 = vld [vmem:[#allocation8 + $0x18] sm:$0xff] }
  0x6c   : > { %867 = vmatpush.msrb.mxu1 %v2869_v55  ;;  %595 = vmatpush.msra.mxu3 %v375_v17  ;;  %v365_v27 = vld [vmem:[#allocation8 + $0x128] sm:$0xff]  ;;  %v363_v29 = vld [vmem:[#allocation8 + $0x118] sm:$0xff] }
  0x6d   : > { %803 = vmatpush.msrb.mxu0 %v2874_v58  ;;  %531 = vmatpush.msra.mxu2 %v341_v18  ;;  %v329_v30 = vld [vmem:[#allocation8 + $0x8] sm:$0xff]  ;;  %v3043_v57 = vld [vmem:[%s2770_s6 + $0x38] sm:$0xff] }
  0x6e   : > { %868 = vmatpush.msrb.mxu1 %v2877_v59  ;;  %596 = vmatpush.msra.mxu3 %v373_v19  ;;  %v361_v31 = vld [vmem:[#allocation8 + $0x108] sm:$0xff]  ;;  %v996_v7 = vld [vmem:[#allocation8 + $0x2f8] sm:$0xff] }
  0x6f   : > { %804 = vmatpush.msrb.mxu0 %v2880_v62  ;;  %532 = vmatpush.msra.mxu2 %v339_v20  ;;  %v1028_v8 = vld [vmem:[#allocation8 + $0x3f8] sm:$0xff]  ;;  %v1026_v12 = vld [vmem:[#allocation8 + $0x3e8] sm:$0xff]  ;;  %v987_v20 = vld [vmem:[#allocation8 + $0x2b0] sm:$0xff] }
  0x70   : > { %869 = vmatpush.msrb.mxu1 %v2883_v63  ;;  %597 = vmatpush.msra.mxu3 %v371_v21  ;;  %v3065_v18 = vld [vmem:[%s2770_s6 + $0x48] sm:$0xff]  ;;  %v1024_v19 = vld [vmem:[#allocation8 + $0x3d8] sm:$0xff] }
  0x71   : > { %805 = vmatpush.msrb.mxu0 %v2896_v4  ;;  %533 = vmatpush.msra.mxu2 %v337_v22  ;;  %v1022_v21 = vld [vmem:[#allocation8 + $0x3c8] sm:$0xff]  ;;  %v985_v22 = vld [vmem:[#allocation8 + $0x2a0] sm:$0xff] }
  0x72   : > { %411 = vmatmul.f32.gmra.mxu0 %v2802_v34  ;;  %870 = vmatpush.msrb.mxu1 %v2901_v5 }
  0x73   : > { %476 = vmatmul.f32.gmra.mxu1 %v2805_v35  ;;  %806 = vmatpush.msrb.mxu0 %v2906_v10 }
  0x74   : > { %871 = vmatpush.msrb.mxu1 %v2909_v11  ;;  %598 = vmatpush.msra.mxu3 %v369_v23  ;;  %v1017_v23 = vld [vmem:[#allocation8 + $0x3a0] sm:$0xff] }
  0x75   : > { %807 = vmatpush.msrb.mxu0 %v2914_v14  ;;  %534 = vmatpush.msra.mxu2 %v335_v24  ;;  %v988_v24 = vld [vmem:[#allocation8 + $0x2b8] sm:$0xff] }
  0x76   : > { %872 = vmatpush.msrb.mxu1 %v2917_v15  ;;  %599 = vmatpush.msra.mxu3 %v367_v25  ;;  %v1020_v25 = vld [vmem:[#allocation8 + $0x3b8] sm:$0xff] }
  0x77   : > { %808 = vmatpush.msrb.mxu0 %v2888_v2  ;;  %535 = vmatpush.msra.mxu2 %v333_v26  ;;  %v983_v26 = vld [vmem:[#allocation8 + $0x290] sm:$0xff] }
  0x78   : > { %873 = vmatpush.msrb.mxu1 %v2891_v3  ;;  %600 = vmatpush.msra.mxu3 %v365_v27  ;;  %v1015_v27 = vld [vmem:[#allocation8 + $0x390] sm:$0xff] }
  0x79   : > { %809 = vmatpush.msrb.mxu0 %v2858_v50  ;;  %536 = vmatpush.msra.mxu2 %v331_v28  ;;  %v986_v28 = vld [vmem:[#allocation8 + $0x2a8] sm:$0xff] }
  0x7a   : > { %414 = vmatmul.f32.gmra.mxu0 %v2810_v36  ;;  %874 = vmatpush.msrb.mxu1 %v2861_v51 }
  0x7b   : > { %479 = vmatmul.f32.gmra.mxu1 %v2813_v37  ;;  %810 = vmatpush.msrb.mxu0 %v2850_v46 }
  0x7c   : > { %875 = vmatpush.msrb.mxu1 %v2853_v47  ;;  %601 = vmatpush.msra.mxu3 %v363_v29  ;;  %v1018_v29 = vld [vmem:[#allocation8 + $0x3a8] sm:$0xff] }
  0x7d   : > { %811 = vmatpush.msrb.mxu0 %v2842_v44  ;;  %537 = vmatpush.msra.mxu2 %v329_v30 }
  0x7e   : > { %876 = vmatpush.msrb.mxu1 %v2845_v45  ;;  %602 = vmatpush.msra.mxu3 %v361_v31 }
  0x7f   : > { %812 = vmatpush.msrb.mxu0 %v2834_v42  ;;  %538 = vmatmul.f32.vlgmr.msra.gmra.mxu2 %v2794_v32 }
  0x80   : > { %877 = vmatpush.msrb.mxu1 %v2837_v43  ;;  %603 = vmatmul.f32.vlgmr.msra.gmra.mxu3 %v2797_v33 }
  0x81   : > { %813 = vmatpush.msrb.mxu0 %v2826_v40  ;;  %1029 = vmatpush.msrb.mxu2 %v995_v1  ;;  %v3076_v1 = vld [vmem:[%s2770_s6 + $0x50] sm:$0xff] }
  0x82   : > { %417 = vmatmul.f32.gmra.mxu0 %v2818_v38  ;;  %878 = vmatpush.msrb.mxu1 %v2829_v41 }
  0x83   : > { %482 = vmatmul.f32.gmra.mxu1 %v2821_v39  ;;  %814 = vmatpush.msrb.mxu0 %v2818_v38 }
  0x84   : > { %879 = vmatpush.msrb.mxu1 %v2821_v39 }
  0x85   : > { %815 = vmatpush.msrb.mxu0 %v2810_v36 }
  0x86   : > { %880 = vmatpush.msrb.mxu1 %v2813_v37 }
  0x87   : > { %816 = vmatpush.msrb.mxu0 %v2802_v34  ;;  %541 = vmatmul.f32.gmra.mxu2 %v2802_v34  ;;  %v2966_v34 = vld [vmem:[%s2770_s6] sm:$0xff] }
  0x88   : > { %881 = vmatpush.msrb.mxu1 %v2805_v35  ;;  %606 = vmatmul.f32.gmra.mxu3 %v2805_v35 }
  0x89   : > { %817 = vmatpush.msrb.mxu0 %v2794_v32 }
  0x8a   : > { %420 = vmatmul.f32.gmra.mxu0 %v2826_v40  ;;  %882 = vmatpush.msrb.mxu1 %v2797_v33 }
  0x8b   : > { %485 = vmatmul.f32.gmra.mxu1 %v2829_v41  ;;  %1159 = vmatpush.msra.mxu0 %v996_v7  ;;  %v1011_v7 = vld [vmem:[#allocation8 + $0x370] sm:$0xff] }
  0x8c   : > { %1224 = vmatpush.msra.mxu1 %v1028_v8  ;;  %v982_v8 = vld [vmem:[#allocation8 + $0x288] sm:$0xff] }
  0x8e   : > { %1225 = vmatpush.msra.mxu1 %v1026_v12  ;;  %v980_v12 = vld [vmem:[#allocation8 + $0x278] sm:$0xff] }
  0x8f   : > { %544 = vmatmul.f32.gmra.mxu2 %v2810_v36 }
  0x90   : > { %609 = vmatmul.f32.gmra.mxu3 %v2813_v37  ;;  %v2977_v37 = vld [vmem:[%s2770_s6 + $0x8] sm:$0xff]  ;;  %1226 = vmatpush.msra.mxu1 %v1024_v19  ;;  %v3087_v19 = vld [vmem:[%s2770_s6 + $0x58] sm:$0xff] }
  0x92   : > { %423 = vmatmul.f32.gmra.mxu0 %v2834_v42  ;;  %1227 = vmatpush.msra.mxu1 %v1022_v21  ;;  %v1005_v21 = vld [vmem:[#allocation8 + $0x340] sm:$0xff] }
  0x93   : > { %488 = vmatmul.f32.gmra.mxu1 %v2837_v43 }
  0x94   : > { %1228 = vmatpush.msra.mxu1 %v1020_v25  ;;  %v1003_v25 = vld [vmem:[#allocation8 + $0x330] sm:$0xff] }
  0x96   : > { %1229 = vmatpush.msra.mxu1 %v1018_v29 }
  0x97   : > { %547 = vmatmul.f32.gmra.mxu2 %v2818_v38 }
  0x98   : > { %612 = vmatmul.f32.gmra.mxu3 %v2821_v39 }
  0x9a   : > { %426 = vmatmul.f32.gmra.mxu0 %v2842_v44 }
  0x9b   : > { %491 = vmatmul.f32.gmra.mxu1 %v2845_v45 }
  0x9f   : > { %550 = vmatmul.f32.gmra.mxu2 %v2826_v40  ;;  %v2988_v40 = vld [vmem:[%s2770_s6 + $0x10] sm:$0xff] }
  0xa0   : > { %615 = vmatmul.f32.gmra.mxu3 %v2829_v41 }
  0xa2   : > { %429 = vmatmul.f32.gmra.mxu0 %v2850_v46 }
  0xa3   : > { %494 = vmatmul.f32.gmra.mxu1 %v2853_v47 }
  0xa7   : > { %553 = vmatmul.f32.gmra.mxu2 %v2834_v42 }
  0xa8   : > { %618 = vmatmul.f32.gmra.mxu3 %v2837_v43  ;;  %v2999_v43 = vld [vmem:[%s2770_s6 + $0x18] sm:$0xff] }
  0xaa   : > { %432 = vmatmul.f32.gmra.mxu0 %v2858_v50 }
  0xab   : > { %497 = vmatmul.f32.gmra.mxu1 %v2861_v51 }
  0xaf   : > { %556 = vmatmul.f32.gmra.mxu2 %v2842_v44 }
  0xb0   : > { %621 = vmatmul.f32.gmra.mxu3 %v2845_v45  ;;  %v3010_v45 = vld [vmem:[%s2770_s6 + $0x20] sm:$0xff] }
  0xb2   : > { %435 = vmatmul.f32.gmra.mxu0 %v2888_v2 }
  0xb3   : > { %500 = vmatmul.f32.gmra.mxu1 %v2891_v3 }
  0xb7   : > { %559 = vmatmul.f32.gmra.mxu2 %v2850_v46 }
  0xb8   : > { %624 = vmatmul.f32.gmra.mxu3 %v2853_v47  ;;  %v3021_v47 = vld [vmem:[%s2770_s6 + $0x28] sm:$0xff] }
  0xba   : > { %438 = vmatmul.f32.gmra.mxu0 %v2914_v14 }
  0xbb   : > { %503 = vmatmul.f32.gmra.mxu1 %v2917_v15 }
  0xbf   : > { %562 = vmatmul.f32.gmra.mxu2 %v2858_v50 }
  0xc0   : > { %627 = vmatmul.f32.gmra.mxu3 %v2861_v51  ;;  %v3032_v51 = vld [vmem:[%s2770_s6 + $0x30] sm:$0xff] }
  0xc2   : > { %441 = vmatmul.f32.gmra.mxu0 %v2906_v10 }
  0xc3   : > { %506 = vmatmul.f32.gmra.mxu1 %v2909_v11 }
  0xc7   : > { %565 = vmatmul.f32.gmra.mxu2 %v2888_v2  ;;  %v1027_v2 = vld [vmem:[#allocation8 + $0x3f0] sm:$0xff] }
  0xc8   : > { %630 = vmatmul.f32.gmra.mxu3 %v2891_v3  ;;  %v993_v3 = vld [vmem:[#allocation8 + $0x2e0] sm:$0xff] }
  0xc9   : > { %1094 = vmatpush.msrb.mxu3 %v1027_v2  ;;  %1030 = vmatpush.msrb.mxu2 %v993_v3  ;;  %v981_v2 = vld [vmem:[#allocation8 + $0x280] sm:$0xff]  ;;  %v1016_v3 = vld [vmem:[#allocation8 + $0x398] sm:$0xff] }
  0xca   : > { %444 = vmatmul.f32.gmra.mxu0 %v2896_v4  ;;  %1230 = vmatpush.msra.mxu1 %v1016_v3  ;;  %v972_v3 = vld [vmem:[#allocation8 + $0x238] sm:$0xff] }
  0xcb   : > { %509 = vmatmul.f32.gmra.mxu1 %v2901_v5  ;;  %1095 = vmatpush.msrb.mxu3 %v1025_v6  ;;  %v979_v6 = vld [vmem:[#allocation8 + $0x270] sm:$0xff] }
  0xcc   : > { %1031 = vmatpush.msrb.mxu2 %v991_v9  ;;  %v1014_v9 = vld [vmem:[#allocation8 + $0x388] sm:$0xff] }
  0xcd   : > { %1231 = vmatpush.msra.mxu1 %v1014_v9  ;;  %v1002_v9 = vld [vmem:[#allocation8 + $0x328] sm:$0xff] }
  0xce   : > { %1032 = vmatpush.msrb.mxu2 %v989_v13  ;;  %v1012_v13 = vld [vmem:[#allocation8 + $0x378] sm:$0xff] }
  0xcf   : > { %568 = vmatmul.f32.gmra.mxu2 %v2914_v14  ;;  %v1021_v14 = vld [vmem:[#allocation8 + $0x3c0] sm:$0xff]  ;;  %1232 = vmatpush.msra.mxu1 %v1012_v13 }
  0xd0   : > { %633 = vmatmul.f32.gmra.mxu3 %v2917_v15  ;;  %v992_v15 = vld [vmem:[#allocation8 + $0x2d8] sm:$0xff]  ;;  %1033 = vmatpush.msrb.mxu2 %v987_v20  ;;  %v975_v20 = vld [vmem:[#allocation8 + $0x250] sm:$0xff] }
  0xd2   : > { %447 = vmatmul.f32.gmra.mxu0 %v2880_v62  ;;  %1034 = vmatpush.msrb.mxu2 %v985_v22  ;;  %v976_v22 = vld [vmem:[#allocation8 + $0x258] sm:$0xff] }
  0xd3   : > { %512 = vmatmul.f32.gmra.mxu1 %v2883_v63 }
  0xd4   : > { %1035 = vmatpush.msrb.mxu2 %v983_v26  ;;  %v974_v26 = vld [vmem:[#allocation8 + $0x248] sm:$0xff] }
  0xd6   : > { %1036 = vmatpush.msrb.mxu2 %v981_v2  ;;  %v3096_v2 = vld [vmem:[%s2770_s6 + $0x60] sm:$0xff] }
  0xd7   : > { %571 = vmatmul.f32.gmra.mxu2 %v2906_v10  ;;  %v1023_v10 = vld [vmem:[#allocation8 + $0x3d0] sm:$0xff] }
  0xd8   : > { %636 = vmatmul.f32.gmra.mxu3 %v2909_v11  ;;  %v994_v11 = vld [vmem:[#allocation8 + $0x2e8] sm:$0xff]  ;;  %1037 = vmatpush.msrb.mxu2 %v979_v6  ;;  %v1004_v6 = vld [vmem:[#allocation8 + $0x338] sm:$0xff] }
  0xd9   : > { %1096 = vmatpush.msrb.mxu3 %v1023_v10  ;;  %1160 = vmatpush.msra.mxu0 %v994_v11  ;;  %v977_v10 = vld [vmem:[#allocation8 + $0x260] sm:$0xff] }
  0xda   : > { %450 = vmatmul.f32.gmra.mxu0 %v2874_v58  ;;  %v1009_v11 = vld [vmem:[#allocation8 + $0x360] sm:$0xff]  ;;  %1038 = vmatpush.msrb.mxu2 %v977_v10 }
  0xdb   : > { %515 = vmatmul.f32.gmra.mxu1 %v2877_v59  ;;  %1097 = vmatpush.msrb.mxu3 %v1021_v14  ;;  %v997_v10 = vld [vmem:[#allocation8 + $0x300] sm:$0xff] }
  0xdc   : > { %1161 = vmatpush.msra.mxu0 %v992_v15  ;;  %1039 = vmatpush.msrb.mxu2 %v975_v20 }
  0xdf   : > { %574 = vmatmul.f32.gmra.mxu2 %v2896_v4  ;;  %v1019_v4 = vld [vmem:[#allocation8 + $0x3b0] sm:$0xff] }
  0xe0   : > { %639 = vmatmul.f32.gmra.mxu3 %v2901_v5  ;;  %v990_v5 = vld [vmem:[#allocation8 + $0x2c8] sm:$0xff] }
  0xe1   : > { %1098 = vmatpush.msrb.mxu3 %v1019_v4  ;;  %1162 = vmatpush.msra.mxu0 %v990_v5  ;;  %v1010_v4 = vld [vmem:[#allocation8 + $0x368] sm:$0xff]  ;;  %v973_v5 = vld [vmem:[#allocation8 + $0x240] sm:$0xff] }
  0xe2   : > { %453 = vmatmul.f32.gmra.mxu0 %v2866_v54  ;;  %1233 = vmatpush.msra.mxu1 %v1010_v4  ;;  %v998_v4 = vld [vmem:[#allocation8 + $0x308] sm:$0xff] }
  0xe3   : > { %518 = vmatmul.f32.gmra.mxu1 %v2869_v55  ;;  %1099 = vmatpush.msrb.mxu3 %v1017_v23  ;;  %v1008_v23 = vld [vmem:[#allocation8 + $0x358] sm:$0xff] }
  0xe4   : > { %1163 = vmatpush.msra.mxu0 %v988_v24  ;;  %1040 = vmatpush.msrb.mxu2 %v973_v5  ;;  %v971_v24 = vld [vmem:[#allocation8 + $0x230] sm:$0xff] }
  0xe5   : > { %1100 = vmatpush.msrb.mxu3 %v1015_v27  ;;  %1234 = vmatpush.msra.mxu1 %v1008_v23  ;;  %v1006_v27 = vld [vmem:[#allocation8 + $0x348] sm:$0xff] }
  0xe6   : > { %1164 = vmatpush.msra.mxu0 %v986_v28  ;;  %1041 = vmatpush.msrb.mxu2 %v971_v24  ;;  %v3120_v24 = vld [vmem:[%s2770_s6 + $0x70] sm:$0xff] }
  0xe7   : > { %v2961_v32 = vpop.f32.mrf.mxu0  ;;  %577 = vmatmul.f32.gmra.mxu2 %v2880_v62  ;;  %v1013_v62 = vld [vmem:[#allocation8 + $0x380] sm:$0xff]  ;;  %1235 = vmatpush.msra.mxu1 %v1006_v27 }
  0xe8   : > { %v2963_v33 = vpop.f32.mrf.mxu1  ;;  %642 = vmatmul.f32.gmra.mxu3 %v2883_v63  ;;  %v984_v63 = vld [vmem:[#allocation8 + $0x298] sm:$0xff] }
  0xe9   : > { %1101 = vmatpush.msrb.mxu3 %v1013_v62  ;;  %1165 = vmatpush.msra.mxu0 %v984_v63  ;;  %v969_v62 = vld [vmem:[#allocation8 + $0x220] sm:$0xff] }
  0xea   : > { %818 = vmatmul.f32.vlgmr.msrb.gmra.mxu0 %v2966_v34  ;;  %v1001_v63 = vld [vmem:[#allocation8 + $0x320] sm:$0xff]  ;;  %1042 = vmatpush.msrb.mxu2 %v969_v62 }
  0xeb   : > { %883 = vmatmul.f32.vlgmr.msrb.gmra.mxu1 %v2966_v34  ;;  %1102 = vmatpush.msrb.mxu3 %v1011_v7  ;;  %v967_v7 = vld [vmem:[#allocation8 + $0x210] sm:$0xff] }
  0xec   : > { %1166 = vmatpush.msra.mxu0 %v982_v8  ;;  %v999_v8 = vld [vmem:[#allocation8 + $0x310] sm:$0xff]  ;;  %1236 = vmatpush.msra.mxu1 %v1004_v6 }
  0xed   : > { %1103 = vmatpush.msrb.mxu3 %v1009_v11  ;;  %1043 = vmatpush.msrb.mxu2 %v967_v7  ;;  %v968_v11 = vld [vmem:[#allocation8 + $0x218] sm:$0xff] }
  0xee   : > { %1167 = vmatpush.msra.mxu0 %v980_v12  ;;  %v1000_v12 = vld [vmem:[#allocation8 + $0x318] sm:$0xff]  ;;  %1237 = vmatpush.msra.mxu1 %v1002_v9 }
  0xef   : > { %v2972_v35 = vpop.f32.mrf.mxu0  ;;  %580 = vmatmul.f32.gmra.mxu2 %v2874_v58  ;;  %v1007_v58 = vld [vmem:[#allocation8 + $0x350] sm:$0xff] }
  0xf0   : > { %v2974_v36 = vpop.f32.mrf.mxu1  ;;  %645 = vmatmul.f32.gmra.mxu3 %v2877_v59  ;;  %v978_v59 = vld [vmem:[#allocation8 + $0x268] sm:$0xff]  ;;  %1238 = vmatpush.msra.mxu1 %v1000_v12 }
  0xf1   : > { %1104 = vmatpush.msrb.mxu3 %v1007_v58  ;;  %1168 = vmatpush.msra.mxu0 %v978_v59  ;;  %v3107_v58 = vld [vmem:[%s2770_s6 + $0x68] sm:$0xff] }
  0xf2   : > { %821 = vmatmul.f32.gmra.mxu0 %v2977_v37  ;;  %v966_v59 = vld [vmem:[#allocation8 + $0x208] sm:$0xff]  ;;  %1239 = vmatpush.msra.mxu1 %v998_v4 }
  0xf3   : > { %886 = vmatmul.f32.gmra.mxu1 %v2977_v37  ;;  %1105 = vmatpush.msrb.mxu3 %v1005_v21 }
  0xf4   : > { %1169 = vmatpush.msra.mxu0 %v976_v22 }
  0xf5   : > { %1106 = vmatpush.msrb.mxu3 %v1003_v25 }
  0xf6   : > { %1170 = vmatpush.msra.mxu0 %v974_v26 }
  0xf7   : > { %v2983_v38 = vpop.f32.mrf.mxu0  ;;  %583 = vmatmul.f32.gmra.mxu2 %v2866_v54  ;;  %1107 = vmatpush.msrb.mxu3 %v1001_v63  ;;  %v970_v54 = vld [vmem:[#allocation8 + $0x228] sm:$0xff]  ;;  %v3133_v63 = vld [vmem:[%s2770_s6 + $0x78] sm:$0xff] }
  0xf8   : > { %v2985_v39 = vpop.f32.mrf.mxu1  ;;  %648 = vmatmul.f32.gmra.mxu3 %v2869_v55  ;;  %1171 = vmatpush.msra.mxu0 %v972_v3  ;;  %v965_v55 = vld [vmem:[#allocation8 + $0x200] sm:$0xff] }
  0xf9   : > { %1108 = vmatpush.msrb.mxu3 %v999_v8  ;;  %1044 = vmatpush.msrb.mxu2 %v965_v55 }
  0xfa   : > { %824 = vmatmul.f32.gmra.mxu0 %v2988_v40 }
  0xfb   : > { %889 = vmatmul.f32.gmra.mxu1 %v2988_v40  ;;  %1172 = vmatpush.msra.mxu0 %v970_v54 }
  0xfc   : > { %1109 = vmatpush.msrb.mxu3 %v997_v10 }
  0xfd   : > { %1173 = vmatpush.msra.mxu0 %v968_v11 }
  0xff   : > { %v2994_v41 = vpop.f32.mrf.mxu0  ;;  %1174 = vmatpush.msra.mxu0 %v966_v59 }
 0x100   : > { %3757 = vst [vmem:[#allocation23_spill] sm:$0xff] %v2994_v41  ;;  %v2996_v42 = vpop.f32.mrf.mxu1 }
 0x101   : > { %3758 = vst [vmem:[#allocation24_spill] sm:$0xff] %v2996_v42 }
 0x102   : > { %827 = vmatmul.f32.gmra.mxu0 %v2999_v43  ;;  %v3109_v5 = vpop.f32.mrf.mxu2 }
 0x103   : > { %892 = vmatmul.f32.gmra.mxu1 %v2999_v43  ;;  %v3111_v21 = vpop.f32.mrf.mxu3 }
 0x107   : > { %v3005_v48 = vpop.f32.mrf.mxu0 }
 0x108   : > { %3759 = vst [vmem:[#allocation25_spill] sm:$0xff] %v3005_v48  ;;  %v3007_v44 = vpop.f32.mrf.mxu1 }
 0x109   : > { %3760 = vst [vmem:[#allocation26_spill] sm:$0xff] %v3007_v44 }
 0x10a   : > { %830 = vmatmul.f32.gmra.mxu0 %v3010_v45  ;;  %v3122_v25 = vpop.f32.mrf.mxu2 }
 0x10b   : > { %895 = vmatmul.f32.gmra.mxu1 %v3010_v45  ;;  %v3124_v26 = vpop.f32.mrf.mxu3 }
 0x10f   : > { %v3016_v49 = vpop.f32.mrf.mxu0 }
 0x110   : > { %3761 = vst [vmem:[#allocation27_spill] sm:$0xff] %v3016_v49  ;;  %v3018_v46 = vpop.f32.mrf.mxu1 }
 0x111   : > { %3762 = vst [vmem:[#allocation28_spill] sm:$0xff] %v3018_v46 }
 0x112   : > { %833 = vmatmul.f32.gmra.mxu0 %v3021_v47  ;;  %v3135_v3 = vpop.f32.mrf.mxu2 }
 0x113   : > { %898 = vmatmul.f32.gmra.mxu1 %v3021_v47  ;;  %v3137_v6 = vpop.f32.mrf.mxu3 }
 0x114   : > { %3783 = vst [vmem:[#allocation49_spill] sm:$0xff] %v3137_v6 }
 0x117   : > { %v3027_v52 = vpop.f32.mrf.mxu0 }
 0x118   : > { %3763 = vst [vmem:[#allocation29_spill] sm:$0xff] %v3027_v52  ;;  %v3029_v50 = vpop.f32.mrf.mxu1 }
 0x119   : > { %3764 = vst [vmem:[#allocation30_spill] sm:$0xff] %v3029_v50 }
 0x11a   : > { %836 = vmatmul.f32.gmra.mxu0 %v3032_v51  ;;  %v3147_v54 = vpop.f32.mrf.mxu2 }
 0x11b   : > { %901 = vmatmul.f32.gmra.mxu1 %v3032_v51  ;;  %3784 = vst [vmem:[#allocation50_spill] sm:$0xff] %v3147_v54  ;;  %v3149_v9 = vpop.f32.mrf.mxu3 }
 0x11c   : > { %3785 = vst [vmem:[#allocation51_spill] sm:$0xff] %v3149_v9 }
 0x11f   : > { %v3038_v53 = vpop.f32.mrf.mxu0 }
 0x120   : > { %3765 = vst [vmem:[#allocation31_spill] sm:$0xff] %v3038_v53  ;;  %v3040_v56 = vpop.f32.mrf.mxu1 }
 0x121   : > { %3766 = vst [vmem:[#allocation32_spill] sm:$0xff] %v3040_v56 }
 0x122   : > { %839 = vmatmul.f32.gmra.mxu0 %v3043_v57  ;;  %v3161_v11 = vpop.f32.mrf.mxu2 }
 0x123   : > { %904 = vmatmul.f32.gmra.mxu1 %v3043_v57  ;;  %3786 = vst [vmem:[#allocation52_spill] sm:$0xff] %v3161_v11  ;;  %v3163_v12 = vpop.f32.mrf.mxu3 }
 0x124   : > { %3787 = vst [vmem:[#allocation53_spill] sm:$0xff] %v3163_v12 }
 0x127   : > { %v3049_v60 = vpop.f32.mrf.mxu0 }
 0x128   : > { %3767 = vst [vmem:[#allocation33_spill] sm:$0xff] %v3049_v60  ;;  %v3051_v61 = vpop.f32.mrf.mxu1 }
 0x129   : > { %3768 = vst [vmem:[#allocation34_spill] sm:$0xff] %v3051_v61 }
 0x12a   : > { %842 = vmatmul.f32.gmra.mxu0 %v3054_v0 }
 0x12b   : > { %907 = vmatmul.f32.gmra.mxu1 %v3054_v0 }
 0x12f   : > { %v3060_v16 = vpop.f32.mrf.mxu0 }
 0x130   : > { %3769 = vst [vmem:[#allocation35_spill] sm:$0xff] %v3060_v16  ;;  %v3062_v17 = vpop.f32.mrf.mxu1 }
 0x131   : > { %3770 = vst [vmem:[#allocation36_spill] sm:$0xff] %v3062_v17 }
 0x132   : > { %845 = vmatmul.f32.gmra.mxu0 %v3065_v18 }
 0x133   : > { %910 = vmatmul.f32.gmra.mxu1 %v3065_v18 }
 0x137   : > { %v3071_v30 = vpop.f32.mrf.mxu0 }
 0x138   : > { %3771 = vst [vmem:[#allocation37_spill] sm:$0xff] %v3071_v30  ;;  %v3073_v31 = vpop.f32.mrf.mxu1 }
 0x139   : > { %3772 = vst [vmem:[#allocation38_spill] sm:$0xff] %v3073_v31 }
 0x13a   : > { %848 = vmatmul.f32.gmra.mxu0 %v3076_v1 }
 0x13b   : > { %913 = vmatmul.f32.gmra.mxu1 %v3076_v1 }
 0x13f   : > { %v3082_v14 = vpop.f32.mrf.mxu0 }
 0x140   : > { %3773 = vst [vmem:[#allocation39_spill] sm:$0xff] %v3082_v14  ;;  %v3084_v15 = vpop.f32.mrf.mxu1 }
 0x141   : > { %3774 = vst [vmem:[#allocation40_spill] sm:$0xff] %v3084_v15 }
 0x142   : > { %851 = vmatmul.f32.gmra.mxu0 %v3087_v19 }
 0x143   : > { %916 = vmatmul.f32.gmra.mxu1 %v3087_v19 }
 0x147   : > { %v3091_v28 = vpop.f32.mrf.mxu0 }
 0x148   : > { %3775 = vst [vmem:[#allocation41_spill] sm:$0xff] %v3091_v28  ;;  %v3093_v29 = vpop.f32.mrf.mxu1 }
 0x149   : > { %3776 = vst [vmem:[#allocation42_spill] sm:$0xff] %v3093_v29 }
 0x14a   : > { %854 = vmatmul.f32.gmra.mxu0 %v3096_v2 }
 0x14b   : > { %919 = vmatmul.f32.gmra.mxu1 %v3096_v2 }
 0x14f   : > { %v3102_v13 = vpop.f32.mrf.mxu0 }
 0x150   : > { %3777 = vst [vmem:[#allocation43_spill] sm:$0xff] %v3102_v13  ;;  %v3104_v20 = vpop.f32.mrf.mxu1 }
 0x151   : > { %3778 = vst [vmem:[#allocation44_spill] sm:$0xff] %v3104_v20 }
 0x152   : > { %857 = vmatmul.f32.gmra.mxu0 %v3107_v58 }
 0x153   : > { %922 = vmatmul.f32.gmra.mxu1 %v3107_v58 }
 0x157   : > { %v3115_v22 = vpop.f32.mrf.mxu0 }
 0x158   : > { %3779 = vst [vmem:[#allocation45_spill] sm:$0xff] %v3115_v22  ;;  %v3117_v23 = vpop.f32.mrf.mxu1 }
 0x159   : > { %3780 = vst [vmem:[#allocation46_spill] sm:$0xff] %v3117_v23 }
 0x15a   : > { %860 = vmatmul.f32.gmra.mxu0 %v3120_v24 }
 0x15b   : > { %925 = vmatmul.f32.gmra.mxu1 %v3120_v24 }
 0x15f   : > { %v3128_v27 = vpop.f32.mrf.mxu0 }
 0x160   : > { %3781 = vst [vmem:[#allocation47_spill] sm:$0xff] %v3128_v27  ;;  %v3130_v62 = vpop.f32.mrf.mxu1  ;;  %v3175_v27 = vpop.f32.mrf.mxu3 }
 0x161   : > { %3782 = vst [vmem:[#allocation48_spill] sm:$0xff] %v3130_v62  ;;  %v3173_v62 = vpop.f32.mrf.mxu2 }
 0x162   : > { %863 = vmatmul.f32.gmra.mxu0 %v3133_v63  ;;  %3788 = vst [vmem:[#allocation54_spill] sm:$0xff] %v3173_v62 }
 0x163   : > { %928 = vmatmul.f32.gmra.mxu1 %v3133_v63  ;;  %3789 = vst [vmem:[#allocation55_spill] sm:$0xff] %v3175_v27 }
 0x167   : > { %v3141_v7 = vpop.f32.mrf.mxu0 }
 0x168   : > { %v3143_v8 = vpop.f32.mrf.mxu1  ;;  %1045 = vmatmul.f32.vlgmr.msrb.gmra.mxu2 %v3141_v7  ;;  %v3187_v13 = vpop.f32.mrf.mxu3 }
 0x169   : > { %1110 = vmatmul.f32.vlgmr.msrb.gmra.mxu3 %v3143_v8  ;;  %v3185_v20 = vpop.f32.mrf.mxu2  ;;  %3791 = vst [vmem:[#allocation57_spill] sm:$0xff] %v3187_v13 }
 0x16a   : > { %1175 = vmatmul.f32.vlgmr.msra.gmra.mxu0 %v3141_v7  ;;  %3790 = vst [vmem:[#allocation56_spill] sm:$0xff] %v3185_v20 }
 0x16b   : > { %1240 = vmatmul.f32.vlgmr.msra.gmra.mxu1 %v3143_v8 }
 0x16f   : > { %v3153_v55 = vpop.f32.mrf.mxu0 }
 0x170   : > { %v3155_v10 = vpop.f32.mrf.mxu1  ;;  %1048 = vmatmul.f32.gmra.mxu2 %v3153_v55  ;;  %v3205_v30 = vpop.f32.mrf.mxu3 }
 0x171   : > { %1113 = vmatmul.f32.gmra.mxu3 %v3155_v10  ;;  %v3203_v31 = vpop.f32.mrf.mxu2  ;;  %3793 = vst [vmem:[#allocation59_spill] sm:$0xff] %v3205_v30 }
 0x172   : > { %1178 = vmatmul.f32.gmra.mxu0 %v3153_v55  ;;  %3792 = vst [vmem:[#allocation58_spill] sm:$0xff] %v3203_v31 }
 0x173   : > { %1243 = vmatmul.f32.gmra.mxu1 %v3155_v10 }
 0x177   : > { %v3165_v59 = vpop.f32.mrf.mxu0 }
 0x178   : > { %v3167_v4 = vpop.f32.mrf.mxu1  ;;  %1051 = vmatmul.f32.gmra.mxu2 %v3165_v59  ;;  %v3219_v60 = vpop.f32.mrf.mxu3 }
 0x179   : > { %1116 = vmatmul.f32.gmra.mxu3 %v3167_v4  ;;  %v3217_v61 = vpop.f32.mrf.mxu2  ;;  %3795 = vst [vmem:[#allocation61_spill] sm:$0xff] %v3219_v60 }
 0x17a   : > { %1181 = vmatmul.f32.gmra.mxu0 %v3165_v59  ;;  %3794 = vst [vmem:[#allocation60_spill] sm:$0xff] %v3217_v61 }
 0x17b   : > { %1246 = vmatmul.f32.gmra.mxu1 %v3167_v4 }
 0x17f   : > { %v3177_v23 = vpop.f32.mrf.mxu0 }
 0x180   : > { %v3179_v22 = vpop.f32.mrf.mxu1  ;;  %1054 = vmatmul.f32.gmra.mxu2 %v3177_v23  ;;  %v3231_v53 = vpop.f32.mrf.mxu3 }
 0x181   : > { %1119 = vmatmul.f32.gmra.mxu3 %v3179_v22  ;;  %v3229_v56 = vpop.f32.mrf.mxu2  ;;  %3797 = vst [vmem:[#allocation63_spill] sm:$0xff] %v3231_v53 }
 0x182   : > { %1184 = vmatmul.f32.gmra.mxu0 %v3177_v23  ;;  %3796 = vst [vmem:[#allocation62_spill] sm:$0xff] %v3229_v56 }
 0x183   : > { %1249 = vmatmul.f32.gmra.mxu1 %v3179_v22 }
 0x187   : > { %v3189_v29 = vpop.f32.mrf.mxu0 }
 0x188   : > { %v3191_v28 = vpop.f32.mrf.mxu1  ;;  %1057 = vmatmul.f32.gmra.mxu2 %v3189_v29  ;;  %v3243_v20 = vpop.f32.mrf.mxu3 }
 0x189   : > { %1122 = vmatmul.f32.gmra.mxu3 %v3191_v28  ;;  %v3241_v60 = vpop.f32.mrf.mxu2  ;;  %3799 = vst [vmem:[#allocation65_spill] sm:$0xff] %v3243_v20 }
 0x18a   : > { %1187 = vmatmul.f32.gmra.mxu0 %v3189_v29  ;;  %3798 = vst [vmem:[#allocation64_spill] sm:$0xff] %v3241_v60 }
 0x18b   : > { %1252 = vmatmul.f32.gmra.mxu1 %v3191_v28 }
 0x18f   : > { %v3197_v15 = vpop.f32.mrf.mxu0 }
 0x190   : > { %v3199_v14 = vpop.f32.mrf.mxu1  ;;  %1060 = vmatmul.f32.gmra.mxu2 %v3197_v15  ;;  %v3255_v60 = vpop.f32.mrf.mxu3 }
 0x191   : > { %1125 = vmatmul.f32.gmra.mxu3 %v3199_v14  ;;  %v3253_v27 = vpop.f32.mrf.mxu2  ;;  %3801 = vst [vmem:[#allocation67_spill] sm:$0xff] %v3255_v60 }
 0x192   : > { %1190 = vmatmul.f32.gmra.mxu0 %v3197_v15  ;;  %3800 = vst [vmem:[#allocation66_spill] sm:$0xff] %v3253_v27 }
 0x193   : > { %1255 = vmatmul.f32.gmra.mxu1 %v3199_v14 }
 0x197   : > { %v3209_v17 = vpop.f32.mrf.mxu0 }
 0x198   : > { %v3211_v16 = vpop.f32.mrf.mxu1  ;;  %1063 = vmatmul.f32.gmra.mxu2 %v3209_v17  ;;  %v3259_v49 = vpop.f32.mrf.mxu3 }
 0x199   : > { %1128 = vmatmul.f32.gmra.mxu3 %v3211_v16  ;;  %v3257_v46 = vpop.f32.mrf.mxu2  ;;  %3803 = vst [vmem:[#allocation69_spill] sm:$0xff] %v3259_v49 }
 0x19a   : > { %1193 = vmatmul.f32.gmra.mxu0 %v3209_v17  ;;  %3802 = vst [vmem:[#allocation68_spill] sm:$0xff] %v3257_v46 }
 0x19b   : > { %1258 = vmatmul.f32.gmra.mxu1 %v3211_v16 }
 0x19f   : > { %v3221_v30 = vpop.f32.mrf.mxu0 }
 0x1a0   : > { %v3223_v31 = vpop.f32.mrf.mxu1  ;;  %1066 = vmatmul.f32.gmra.mxu2 %v3221_v30  ;;  %v3263_v60 = vpop.f32.mrf.mxu3 }
 0x1a1   : > { %1131 = vmatmul.f32.gmra.mxu3 %v3223_v31  ;;  %v3261_v27 = vpop.f32.mrf.mxu2  ;;  %3805 = vst [vmem:[#allocation71_spill] sm:$0xff] %v3263_v60 }
 0x1a2   : > { %1196 = vmatmul.f32.gmra.mxu0 %v3221_v30  ;;  %3804 = vst [vmem:[#allocation70_spill] sm:$0xff] %v3261_v27 }
 0x1a3   : > { %1261 = vmatmul.f32.gmra.mxu1 %v3223_v31 }
 0x1a7   : > { %v3233_v13 = vpop.f32.mrf.mxu0 }
 0x1a8   : > { %v3235_v61 = vpop.f32.mrf.mxu1  ;;  %1069 = vmatmul.f32.gmra.mxu2 %v3233_v13  ;;  %v3267_v46 = vpop.f32.mrf.mxu3 }
 0x1a9   : > { %1134 = vmatmul.f32.gmra.mxu3 %v3235_v61  ;;  %v3265_v9 = vpop.f32.mrf.mxu2  ;;  %3807 = vst [vmem:[#allocation73_spill] sm:$0xff] %v3267_v46 }
 0x1aa   : > { %1199 = vmatmul.f32.gmra.mxu0 %v3233_v13  ;;  %3806 = vst [vmem:[#allocation72_spill] sm:$0xff] %v3265_v9 }
 0x1ab   : > { %1264 = vmatmul.f32.gmra.mxu1 %v3235_v61 }
 0x1af   : > { %v3245_v50 = vpop.f32.mrf.mxu0 }
 0x1b0   : > { %v3247_v56 = vpop.f32.mrf.mxu1  ;;  %1072 = vmatmul.f32.gmra.mxu2 %v3245_v50  ;;  %v3271_v41 = vpop.f32.mrf.mxu3 }
 0x1b1   : > { %1137 = vmatmul.f32.gmra.mxu3 %v3247_v56  ;;  %v3269_v60 = vpop.f32.mrf.mxu2  ;;  %3809 = vst [vmem:[#allocation75_spill] sm:$0xff] %v3271_v41 }
 0x1b2   : > { %1202 = vmatmul.f32.gmra.mxu0 %v3245_v50  ;;  %3808 = vst [vmem:[#allocation74_spill] sm:$0xff] %v3269_v60 }
 0x1b3   : > { %1267 = vmatmul.f32.gmra.mxu1 %v3247_v56 }
 0x1b7   : > { %v849_v53 = vpop.f32.mrf.mxu0 }
 0x1b8   : > { %v914_v52 = vpop.f32.mrf.mxu1  ;;  %1075 = vmatmul.f32.gmra.mxu2 %v849_v53 }
 0x1b9   : > { %1140 = vmatmul.f32.gmra.mxu3 %v914_v52 }
 0x1ba   : > { %1205 = vmatmul.f32.gmra.mxu0 %v849_v53 }
 0x1bb   : > { %1270 = vmatmul.f32.gmra.mxu1 %v914_v52 }
 0x1bf   : > { %v852_v20 = vpop.f32.mrf.mxu0 }
 0x1c0   : > { %v917_v62 = vpop.f32.mrf.mxu1  ;;  %1078 = vmatmul.f32.gmra.mxu2 %v852_v20 }
 0x1c1   : > { %1143 = vmatmul.f32.gmra.mxu3 %v917_v62 }
 0x1c2   : > { %1208 = vmatmul.f32.gmra.mxu0 %v852_v20 }
 0x1c3   : > { %1273 = vmatmul.f32.gmra.mxu1 %v917_v62 }
 0x1c7   : > { %v855_v12 = vpop.f32.mrf.mxu0 }
 0x1c8   : > { %v920_v11 = vpop.f32.mrf.mxu1  ;;  %1081 = vmatmul.f32.gmra.mxu2 %v855_v12 }
 0x1c9   : > { %1146 = vmatmul.f32.gmra.mxu3 %v920_v11 }
 0x1ca   : > { %1211 = vmatmul.f32.gmra.mxu0 %v855_v12 }
 0x1cb   : > { %1276 = vmatmul.f32.gmra.mxu1 %v920_v11 }
 0x1cf   : > { %v858_v44 = vpop.f32.mrf.mxu0 }
 0x1d0   : > { %v923_v48 = vpop.f32.mrf.mxu1  ;;  %1084 = vmatmul.f32.gmra.mxu2 %v858_v44 }
 0x1d1   : > { %1149 = vmatmul.f32.gmra.mxu3 %v923_v48 }
 0x1d2   : > { %1214 = vmatmul.f32.gmra.mxu0 %v858_v44 }
 0x1d3   : > { %1279 = vmatmul.f32.gmra.mxu1 %v923_v48 }
 0x1d7   : > { %v861_v49 = vpop.f32.mrf.mxu0 }
 0x1d8   : > { %v926_v54 = vpop.f32.mrf.mxu1  ;;  %1087 = vmatmul.f32.gmra.mxu2 %v861_v49 }
 0x1d9   : > { %1152 = vmatmul.f32.gmra.mxu3 %v926_v54 }
 0x1da   : > { %1217 = vmatmul.f32.gmra.mxu0 %v861_v49 }
 0x1db   : > { %1282 = vmatmul.f32.gmra.mxu1 %v926_v54 }
 0x1df   : > { %v864_v42 = vpop.f32.mrf.mxu0 }
 0x1e0   : > { %v929_v27 = vpop.f32.mrf.mxu1  ;;  %1090 = vmatmul.f32.gmra.mxu2 %v864_v42 }
 0x1e1   : > { %1155 = vmatmul.f32.gmra.mxu3 %v929_v27  ;;  %1353 = vmatpush.msra.mxu2 %v864_v42 }
 0x1e2   : > { %1418 = vmatpush.msra.mxu3 %v929_v27  ;;  %1220 = vmatmul.f32.gmra.mxu0 %v864_v42 }
 0x1e3   : > { %1285 = vmatmul.f32.gmra.mxu1 %v929_v27  ;;  %1354 = vmatpush.msra.mxu2 %v861_v49 }
 0x1e4   : > { %1419 = vmatpush.msra.mxu3 %v926_v54 }
 0x1e5   : > { %1355 = vmatpush.msra.mxu2 %v858_v44 }
 0x1e6   : > { %1420 = vmatpush.msra.mxu3 %v923_v48 }
 0x1e7   : > { %1356 = vmatpush.msra.mxu2 %v855_v12  ;;  %v3273_v46 = vpop.f32.mrf.mxu0 }
 0x1e8   : > { %1421 = vmatpush.msra.mxu3 %v920_v11  ;;  %v3275_v9 = vpop.f32.mrf.mxu1 }
 0x1e9   : > { %1357 = vmatpush.msra.mxu2 %v852_v20 }
 0x1ea   : > { %1422 = vmatpush.msra.mxu3 %v917_v62 }
 0x1eb   : > { %1358 = vmatpush.msra.mxu2 %v849_v53  ;;  %v3277_v6 = vpop.f32.mrf.mxu2 }
 0x1ec   : > { %1423 = vmatpush.msra.mxu3 %v914_v52  ;;  %v3279_v60 = vpop.f32.mrf.mxu3 }
 0x1ed   : > { %1359 = vmatpush.msra.mxu2 %v3245_v50 }
 0x1ee   : > { %1424 = vmatpush.msra.mxu3 %v3247_v56 }
 0x1ef   : > { %1360 = vmatpush.msra.mxu2 %v3233_v13  ;;  %v3285_v42 = vpop.f32.mrf.mxu0 }
 0x1f0   : > { %1425 = vmatpush.msra.mxu3 %v3235_v61  ;;  %v3287_v48 = vpop.f32.mrf.mxu1 }
 0x1f1   : > { %1361 = vmatpush.msra.mxu2 %v3221_v30 }
 0x1f2   : > { %1426 = vmatpush.msra.mxu3 %v3223_v31 }
 0x1f3   : > { %1362 = vmatpush.msra.mxu2 %v3209_v17  ;;  %v3293_v44 = vpop.f32.mrf.mxu2 }
 0x1f4   : > { %1427 = vmatpush.msra.mxu3 %v3211_v16  ;;  %v3295_v49 = vpop.f32.mrf.mxu3 }
 0x1f5   : > { %1363 = vmatpush.msra.mxu2 %v3197_v15 }
 0x1f6   : > { %1428 = vmatpush.msra.mxu3 %v3199_v14 }
 0x1f7   : > { %1364 = vmatpush.msra.mxu2 %v3189_v29  ;;  %v3301_v52 = vpop.f32.mrf.mxu0 }
 0x1f8   : > { %1429 = vmatpush.msra.mxu3 %v3191_v28  ;;  %v3303_v50 = vpop.f32.mrf.mxu1 }
 0x1f9   : > { %1365 = vmatpush.msra.mxu2 %v3177_v23 }
 0x1fa   : > { %1430 = vmatpush.msra.mxu3 %v3179_v22 }
 0x1fb   : > { %1366 = vmatpush.msra.mxu2 %v3165_v59  ;;  %v3309_v53 = vpop.f32.mrf.mxu2 }
 0x1fc   : > { %1431 = vmatpush.msra.mxu3 %v3167_v4  ;;  %v3311_v56 = vpop.f32.mrf.mxu3 }
 0x1fd   : > { %1367 = vmatpush.msra.mxu2 %v3153_v55 }
 0x1fe   : > { %1432 = vmatpush.msra.mxu3 %v3155_v10 }
 0x1ff   : > { %1368 = vmatpush.msra.mxu2 %v3141_v7  ;;  %v3317_v61 = vpop.f32.mrf.mxu0 }
 0x200   : > { %1433 = vmatpush.msra.mxu3 %v3143_v8  ;;  %v3319_v16 = vpop.f32.mrf.mxu1  ;;  %1369 = vmatmul.f32.vlgmr.msra.gmra.mxu2 %v2966_v34 }
 0x201   : > { %1434 = vmatmul.f32.vlgmr.msra.gmra.mxu3 %v2966_v34 }
 0x203   : > { %v3323_v17 = vpop.f32.mrf.mxu2 }
 0x204   : > { %v3325_v30 = vpop.f32.mrf.mxu3 }
 0x207   : > { %v3327_v31 = vpop.f32.mrf.mxu0 }
 0x208   : > { %v3329_v14 = vpop.f32.mrf.mxu1  ;;  %1372 = vmatmul.f32.gmra.mxu2 %v2977_v37 }
 0x209   : > { %1437 = vmatmul.f32.gmra.mxu3 %v2977_v37 }
 0x20b   : > { %v3333_v15 = vpop.f32.mrf.mxu2 }
 0x20c   : > { %v3335_v28 = vpop.f32.mrf.mxu3 }
 0x20f   : > { %v3337_v29 = vpop.f32.mrf.mxu0 }
 0x210   : > { %v3339_v13 = vpop.f32.mrf.mxu1  ;;  %1375 = vmatmul.f32.gmra.mxu2 %v2988_v40 }
 0x211   : > { %1440 = vmatmul.f32.gmra.mxu3 %v2988_v40 }
 0x213   : > { %v3343_v34 = vpop.f32.mrf.mxu2 }
 0x214   : > { %v3345_v20 = vpop.f32.mrf.mxu3 }
 0x217   : > { %v3347_v22 = vpop.f32.mrf.mxu0 }
 0x218   : > { %v3349_v23 = vpop.f32.mrf.mxu1  ;;  %1378 = vmatmul.f32.gmra.mxu2 %v2999_v43 }
 0x219   : > { %1443 = vmatmul.f32.gmra.mxu3 %v2999_v43 }
 0x21b   : > { %v3357_v62 = vpop.f32.mrf.mxu2 }
 0x21c   : > { %v3359_v7 = vpop.f32.mrf.mxu3 }
 0x21f   : > { %v3353_v37 = vpop.f32.mrf.mxu0 }
 0x220   : > { %v3355_v27 = vpop.f32.mrf.mxu1  ;;  %1381 = vmatmul.f32.gmra.mxu2 %v3010_v45 }
 0x221   : > { %1446 = vmatmul.f32.gmra.mxu3 %v3010_v45 }
 0x223   : > { %v3367_v43 = vpop.f32.mrf.mxu2 }
 0x224   : > { %v3369_v55 = vpop.f32.mrf.mxu3 }
 0x227   : > { %v1200_v40 = vpop.f32.mrf.mxu0 }
 0x228   : > { %v1265_v8 = vpop.f32.mrf.mxu1  ;;  %1384 = vmatmul.f32.gmra.mxu2 %v3021_v47 }
 0x229   : > { %v3363_v54 = vadd.f32 %v1265_v8, %v1200_v40  ;;  %1449 = vmatmul.f32.gmra.mxu3 %v3021_v47 }
 0x22b   : > { %3810 = vst [vmem:[#allocation76_spill] sm:$0xff] %v3363_v54  ;;  %v3375_v45 = vpop.f32.mrf.mxu2 }
 0x22c   : > { %3812 = vst [vmem:[#allocation78_spill] sm:$0xff] %v3375_v45  ;;  %v3377_v59 = vpop.f32.mrf.mxu3  ;;  %v1636_v45 = vld [vmem:[#allocation8 + $0x5c0] sm:$0xff] }
 0x22d   : > { %3813 = vst [vmem:[#allocation79_spill] sm:$0xff] %v3377_v59  ;;  %v1639_v59 = vld [vmem:[#allocation8 + $0x5d8] sm:$0xff] }
 0x22f   : > { %v1203_v10 = vpop.f32.mrf.mxu0 }
 0x230   : > { %v1268_v11 = vpop.f32.mrf.mxu1  ;;  %1387 = vmatmul.f32.gmra.mxu2 %v3032_v51 }
 0x231   : > { %v3371_v12 = vadd.f32 %v1268_v11, %v1203_v10  ;;  %1452 = vmatmul.f32.gmra.mxu3 %v3032_v51 }
 0x233   : > { %3811 = vst [vmem:[#allocation77_spill] sm:$0xff] %v3371_v12  ;;  %v3383_v47 = vpop.f32.mrf.mxu2 }
 0x234   : > { %3815 = vst [vmem:[#allocation81_spill] sm:$0xff] %v3383_v47  ;;  %v3385_v10 = vpop.f32.mrf.mxu3 }
 0x235   : > { %3816 = vst [vmem:[#allocation82_spill] sm:$0xff] %v3385_v10 }
 0x237   : > { %v1206_v4 = vpop.f32.mrf.mxu0 }
 0x238   : > { %v1271_v40 = vpop.f32.mrf.mxu1  ;;  %1390 = vmatmul.f32.gmra.mxu2 %v3043_v57 }
 0x239   : > { %v3379_v8 = vadd.f32 %v1271_v40, %v1206_v4  ;;  %1455 = vmatmul.f32.gmra.mxu3 %v3043_v57  ;;  %v1610_v57 = vld [vmem:[#allocation8 + $0x4f0] sm:$0xff] }
 0x23a   : > { %v1642_v40 = vld [vmem:[#allocation8 + $0x5f0] sm:$0xff]  ;;  %1644 = vmatpush.msrb.mxu0 %v1610_v57  ;;  %v1605_v57 = vld [vmem:[#allocation8 + $0x4c8] sm:$0xff] }
 0x23b   : > { %3814 = vst [vmem:[#allocation80_spill] sm:$0xff] %v3379_v8  ;;  %v1611_v8 = vld [vmem:[#allocation8 + $0x4f8] sm:$0xff]  ;;  %v3395_v10 = vpop.f32.mrf.mxu2  ;;  %1709 = vmatpush.msrb.mxu1 %v1642_v40  ;;  %v1637_v40 = vld [vmem:[#allocation8 + $0x5c8] sm:$0xff] }
 0x23c   : > { %3819 = vst [vmem:[#allocation85_spill] sm:$0xff] %v3395_v10  ;;  %v3397_v47 = vpop.f32.mrf.mxu3  ;;  %1774 = vmatpush.msrb.mxu2 %v1611_v8  ;;  %v1604_v10 = vld [vmem:[#allocation8 + $0x4c0] sm:$0xff] }
 0x23d   : > { %3820 = vst [vmem:[#allocation86_spill] sm:$0xff] %v3397_v47 }
 0x23f   : > { %v1209_v11 = vpop.f32.mrf.mxu0 }
 0x240   : > { %v1274_v41 = vpop.f32.mrf.mxu1  ;;  %1393 = vmatmul.f32.gmra.mxu2 %v3054_v0 }
 0x241   : > { %v3387_v12 = vadd.f32 %v1274_v41, %v1209_v11  ;;  %1458 = vmatmul.f32.gmra.mxu3 %v3054_v0  ;;  %v1643_v41 = vld [vmem:[#allocation8 + $0x5f8] sm:$0xff]  ;;  %v1608_v11 = vld [vmem:[#allocation8 + $0x4e0] sm:$0xff] }
 0x242   : > { %v1640_v0 = vld [vmem:[#allocation8 + $0x5e0] sm:$0xff]  ;;  %1839 = vmatpush.msrb.mxu3 %v1643_v41  ;;  %1645 = vmatpush.msrb.mxu0 %v1608_v11  ;;  %v1602_v11 = vld [vmem:[#allocation8 + $0x4b0] sm:$0xff] }
 0x243   : > { %3817 = vst [vmem:[#allocation83_spill] sm:$0xff] %v3387_v12  ;;  %1710 = vmatpush.msrb.mxu1 %v1640_v0  ;;  %v1607_v12 = vld [vmem:[#allocation8 + $0x4d8] sm:$0xff]  ;;  %v1634_v0 = vld [vmem:[#allocation8 + $0x5b0] sm:$0xff] }
 0x247   : > { %v1212_v51 = vpop.f32.mrf.mxu0 }
 0x248   : > { %v1277_v54 = vpop.f32.mrf.mxu1  ;;  %1396 = vmatmul.f32.gmra.mxu2 %v3065_v18 }
 0x249   : > { %v3391_v4 = vadd.f32 %v1277_v54, %v1212_v51  ;;  %1461 = vmatmul.f32.gmra.mxu3 %v3065_v18  ;;  %v1609_v54 = vld [vmem:[#allocation8 + $0x4e8] sm:$0xff]  ;;  %v1638_v18 = vld [vmem:[#allocation8 + $0x5d0] sm:$0xff] }
 0x24a   : > { %v1641_v51 = vld [vmem:[#allocation8 + $0x5e8] sm:$0xff]  ;;  %1775 = vmatpush.msrb.mxu2 %v1609_v54  ;;  %1711 = vmatpush.msrb.mxu1 %v1638_v18  ;;  %v1603_v54 = vld [vmem:[#allocation8 + $0x4b8] sm:$0xff] }
 0x24b   : > { %3818 = vst [vmem:[#allocation84_spill] sm:$0xff] %v3391_v4  ;;  %v1606_v4 = vld [vmem:[#allocation8 + $0x4d0] sm:$0xff]  ;;  %1840 = vmatpush.msrb.mxu3 %v1641_v51  ;;  %v1601_v51 = vld [vmem:[#allocation8 + $0x4a8] sm:$0xff] }
 0x24c   : > { %1646 = vmatpush.msrb.mxu0 %v1606_v4  ;;  %1776 = vmatpush.msrb.mxu2 %v1607_v12  ;;  %v1635_v4 = vld [vmem:[#allocation8 + $0x5b8] sm:$0xff]  ;;  %v1600_v12 = vld [vmem:[#allocation8 + $0x4a0] sm:$0xff]  ;;  %v1633_v18 = vld [vmem:[#allocation8 + $0x5a8] sm:$0xff] }
 0x24d   : > { %1841 = vmatpush.msrb.mxu3 %v1639_v59  ;;  %1712 = vmatpush.msrb.mxu1 %v1636_v45  ;;  %v1632_v59 = vld [vmem:[#allocation8 + $0x5a0] sm:$0xff]  ;;  %v3405_v45 = vpop.f32.mrf.mxu3 }
 0x24e   : > { %1647 = vmatpush.msrb.mxu0 %v1604_v10  ;;  %1777 = vmatpush.msrb.mxu2 %v1605_v57  ;;  %v3403_v10 = vpop.f32.mrf.mxu2  ;;  %3823 = vst [vmem:[#allocation89_spill] sm:$0xff] %v3405_v45  ;;  %v1631_v57 = vld [vmem:[#allocation8 + $0x598] sm:$0xff]  ;;  %v1629_v45 = vld [vmem:[#allocation8 + $0x588] sm:$0xff] }
 0x24f   : > { %v1215_v8 = vpop.f32.mrf.mxu0  ;;  %1842 = vmatpush.msrb.mxu3 %v1637_v40  ;;  %1713 = vmatpush.msrb.mxu1 %v1634_v0  ;;  %3822 = vst [vmem:[#allocation88_spill] sm:$0xff] %v3403_v10  ;;  %v1596_v40 = vld [vmem:[#allocation8 + $0x480] sm:$0xff]  ;;  %v1597_v10 = vld [vmem:[#allocation8 + $0x488] sm:$0xff] }
 0x250   : > { %v1280_v41 = vpop.f32.mrf.mxu1  ;;  %1399 = vmatmul.f32.gmra.mxu2 %v3076_v1  ;;  %1648 = vmatpush.msrb.mxu0 %v1602_v11  ;;  %v1628_v11 = vld [vmem:[#allocation8 + $0x580] sm:$0xff] }
 0x251   : > { %v3399_v47 = vadd.f32 %v1280_v41, %v1215_v8  ;;  %1464 = vmatmul.f32.gmra.mxu3 %v3076_v1  ;;  %1778 = vmatpush.msrb.mxu2 %v1603_v54  ;;  %v1598_v8 = vld [vmem:[#allocation8 + $0x490] sm:$0xff]  ;;  %v1599_v41 = vld [vmem:[#allocation8 + $0x498] sm:$0xff] }
 0x252   : > { %1843 = vmatpush.msrb.mxu3 %v1635_v4  ;;  %v1630_v1 = vld [vmem:[#allocation8 + $0x590] sm:$0xff]  ;;  %1649 = vmatpush.msrb.mxu0 %v1600_v12 }
 0x253   : > { %3821 = vst [vmem:[#allocation87_spill] sm:$0xff] %v3399_v47  ;;  %1714 = vmatpush.msrb.mxu1 %v1632_v59  ;;  %1779 = vmatpush.msrb.mxu2 %v1601_v51  ;;  %v1594_v4 = vld [vmem:[#allocation8 + $0x470] sm:$0xff]  ;;  %v1595_v59 = vld [vmem:[#allocation8 + $0x478] sm:$0xff] }
 0x254   : > { %1844 = vmatpush.msrb.mxu3 %v1633_v18  ;;  %1650 = vmatpush.msrb.mxu0 %v1598_v8  ;;  %v1626_v12 = vld [vmem:[#allocation8 + $0x570] sm:$0xff]  ;;  %v1627_v51 = vld [vmem:[#allocation8 + $0x578] sm:$0xff]  ;;  %v1592_v18 = vld [vmem:[#allocation8 + $0x460] sm:$0xff] }
 0x255   : > { %1715 = vmatpush.msrb.mxu1 %v1630_v1  ;;  %1780 = vmatpush.msrb.mxu2 %v1599_v41  ;;  %v1624_v8 = vld [vmem:[#allocation8 + $0x560] sm:$0xff]  ;;  %v1593_v1 = vld [vmem:[#allocation8 + $0x468] sm:$0xff] }
 0x256   : > { %1845 = vmatpush.msrb.mxu3 %v1631_v57  ;;  %1651 = vmatpush.msrb.mxu0 %v1596_v40  ;;  %v1625_v41 = vld [vmem:[#allocation8 + $0x568] sm:$0xff]  ;;  %v1622_v57 = vld [vmem:[#allocation8 + $0x550] sm:$0xff]  ;;  %v1588_v40 = vld [vmem:[#allocation8 + $0x440] sm:$0xff] }
 0x257   : > { %v1218_v0 = vpop.f32.mrf.mxu0  ;;  %1716 = vmatpush.msrb.mxu1 %v1628_v11  ;;  %1781 = vmatpush.msrb.mxu2 %v1597_v10  ;;  %v1591_v10 = vld [vmem:[#allocation8 + $0x458] sm:$0xff]  ;;  %v1620_v11 = vld [vmem:[#allocation8 + $0x540] sm:$0xff] }
 0x258   : > { %v1283_v47 = vpop.f32.mrf.mxu1  ;;  %1402 = vmatmul.f32.gmra.mxu2 %v3087_v19  ;;  %1846 = vmatpush.msrb.mxu3 %v1629_v45  ;;  %v1623_v45 = vld [vmem:[#allocation8 + $0x558] sm:$0xff] }
 0x259   : > { %v3407_v54 = vadd.f32 %v1283_v47, %v1218_v0  ;;  %1467 = vmatmul.f32.gmra.mxu3 %v3087_v19  ;;  %1652 = vmatpush.msrb.mxu0 %v1594_v4  ;;  %v1590_v47 = vld [vmem:[#allocation8 + $0x450] sm:$0xff]  ;;  %v3411_v0 = vpop.f32.mrf.mxu2  ;;  %v3413_v19 = vpop.f32.mrf.mxu3  ;;  %v1589_v4 = vld [vmem:[#allocation8 + $0x448] sm:$0xff] }
 0x25a   : > { %1717 = vmatpush.msrb.mxu1 %v1626_v12  ;;  %1782 = vmatpush.msrb.mxu2 %v1595_v59  ;;  %v1621_v12 = vld [vmem:[#allocation8 + $0x548] sm:$0xff]  ;;  %v1586_v59 = vld [vmem:[#allocation8 + $0x430] sm:$0xff] }
 0x25b   : > { %3824 = vst [vmem:[#allocation90_spill] sm:$0xff] %v3407_v54  ;;  %1847 = vmatpush.msrb.mxu3 %v1627_v51  ;;  %1653 = vmatpush.msrb.mxu0 %v1592_v18  ;;  %v1618_v51 = vld [vmem:[#allocation8 + $0x530] sm:$0xff]  ;;  %v1587_v18 = vld [vmem:[#allocation8 + $0x438] sm:$0xff] }
 0x25c   : > { %1718 = vmatpush.msrb.mxu1 %v1624_v8  ;;  %1783 = vmatpush.msrb.mxu2 %v1593_v1  ;;  %v1619_v8 = vld [vmem:[#allocation8 + $0x538] sm:$0xff]  ;;  %v1584_v1 = vld [vmem:[#allocation8 + $0x420] sm:$0xff]  ;;  %v2324_v54 = vld [vmem:[%s2783_s11 + $0x10] sm:$0xff] }
 0x25d   : > { %1848 = vmatpush.msrb.mxu3 %v1625_v41  ;;  %1654 = vmatpush.msrb.mxu0 %v1590_v47  ;;  %v1616_v41 = vld [vmem:[#allocation8 + $0x520] sm:$0xff]  ;;  %v1585_v47 = vld [vmem:[#allocation8 + $0x428] sm:$0xff] }
 0x25e   : > { %1719 = vmatpush.msrb.mxu1 %v1622_v57  ;;  %1784 = vmatpush.msrb.mxu2 %v1591_v10  ;;  %v1617_v57 = vld [vmem:[#allocation8 + $0x528] sm:$0xff]  ;;  %v1614_v10 = vld [vmem:[#allocation8 + $0x510] sm:$0xff] }
 0x25f   : > { %1849 = vmatpush.msrb.mxu3 %v1623_v45  ;;  %1655 = vmatpush.msrb.mxu0 %v1588_v40 }
 0x260   : > { %1405 = vmatmul.f32.gmra.mxu2 %v3096_v2  ;;  %1720 = vmatpush.msrb.mxu1 %v1620_v11  ;;  %v1583_v11 = vld [vmem:[#allocation8 + $0x418] sm:$0xff] }
 0x261   : > { %1470 = vmatmul.f32.gmra.mxu3 %v3096_v2  ;;  %1785 = vmatpush.msrb.mxu2 %v1589_v4  ;;  %v1582_v2 = vld [vmem:[#allocation8 + $0x410] sm:$0xff]  ;;  %v3417_v45 = vpop.f32.mrf.mxu2  ;;  %v3419_v40 = vpop.f32.mrf.mxu3  ;;  %v1615_v4 = vld [vmem:[#allocation8 + $0x518] sm:$0xff] }
 0x262   : > { %1850 = vmatpush.msrb.mxu3 %v1621_v12  ;;  %1656 = vmatpush.msrb.mxu0 %v1586_v59  ;;  %v1580_v12 = vld [vmem:[#allocation8 + $0x400] sm:$0xff] }
 0x263   : > { %1721 = vmatpush.msrb.mxu1 %v1618_v51  ;;  %1786 = vmatpush.msrb.mxu2 %v1587_v18  ;;  %v1612_v59 = vld [vmem:[#allocation8 + $0x500] sm:$0xff]  ;;  %v1581_v51 = vld [vmem:[#allocation8 + $0x408] sm:$0xff] }
 0x264   : > { %1851 = vmatpush.msrb.mxu3 %v1619_v8  ;;  %1657 = vmatpush.msrb.mxu0 %v1584_v1  ;;  %v1613_v18 = vld [vmem:[#allocation8 + $0x508] sm:$0xff] }
 0x265   : > { %1722 = vmatpush.msrb.mxu1 %v1616_v41  ;;  %1787 = vmatpush.msrb.mxu2 %v1585_v47 }
 0x266   : > { %1852 = vmatpush.msrb.mxu3 %v1617_v57  ;;  %1658 = vmatpush.msrb.mxu0 %v1582_v2 }
 0x267   : > { %1723 = vmatpush.msrb.mxu1 %v1614_v10  ;;  %1788 = vmatpush.msrb.mxu2 %v1583_v11  ;;  %v2322_v11 = vld [vmem:[%s2783_s11] sm:$0xff] }
 0x268   : > { %1408 = vmatmul.f32.gmra.mxu2 %v3107_v58  ;;  %1853 = vmatpush.msrb.mxu3 %v1615_v4  ;;  %v2323_v4 = vld [vmem:[%s2783_s11 + $0x8] sm:$0xff] }
 0x269   : > { %1473 = vmatmul.f32.gmra.mxu3 %v3107_v58  ;;  %1659 = vmatpush.msrb.mxu0 %v1580_v12  ;;  %v3425_v8 = vpop.f32.mrf.mxu2  ;;  %v3427_v58 = vpop.f32.mrf.mxu3 }
 0x26a   : > { %1724 = vmatpush.msrb.mxu1 %v1612_v59  ;;  %1789 = vmatpush.msrb.mxu2 %v1581_v51 }
 0x26b   : > { %1854 = vmatpush.msrb.mxu3 %v1613_v18 }
 0x270   : > { %1411 = vmatmul.f32.gmra.mxu2 %v3120_v24 }
 0x271   : > { %1476 = vmatmul.f32.gmra.mxu3 %v3120_v24  ;;  %v3431_v1 = vpop.f32.mrf.mxu2  ;;  %v3433_v41 = vpop.f32.mrf.mxu3 }
 0x272   : > { %3825 = vst [vmem:[#allocation91_spill] sm:$0xff] %v3431_v1  ;;  %v2325_v1 = vld [vmem:[%s2783_s11 + $0x18] sm:$0xff] }
 0x273   : > { %3826 = vst [vmem:[#allocation92_spill] sm:$0xff] %v3433_v41 }
 0x278   : > { %1414 = vmatmul.f32.gmra.mxu2 %v3133_v63 }
 0x279   : > { %1479 = vmatmul.f32.gmra.mxu3 %v3133_v63 }
 0x283   : > { %v1370_v47 = vpop.f32.mrf.mxu2 }
 0x284   : > { %v1435_v57 = vpop.f32.mrf.mxu3  ;;  %v1483_v2 = vmul.f32 2.0, %v1370_v47 }
 0x285   : > { %v1484_v10 = vmul.f32 2.0, %v1435_v57 }
 0x286   : > { %v1515_v24 = vsub.f32 %v1483_v2, %v2322_v11 }
 0x287   : > { %v1516_v12 = vsub.f32 %v1484_v10, %v2323_v4 }
 0x288   : > { %1660 = vmatmul.f32.vlgmr.msrb.gmra.mxu0 %v1515_v24  ;;  %1790 = vmatmul.f32.vlgmr.msrb.gmra.mxu2 %v1515_v24  ;;  %v2326_v24 = vld [vmem:[%s2783_s11 + $0x20] sm:$0xff] }
 0x289   : > { %1725 = vmatmul.f32.vlgmr.msrb.gmra.mxu1 %v1516_v12  ;;  %1855 = vmatmul.f32.vlgmr.msrb.gmra.mxu3 %v1516_v12  ;;  %v2327_v12 = vld [vmem:[%s2783_s11 + $0x28] sm:$0xff] }
 0x28b   : > { %v1373_v59 = vpop.f32.mrf.mxu2 }
 0x28c   : > { %v1438_v63 = vpop.f32.mrf.mxu3  ;;  %v1485_v51 = vmul.f32 2.0, %v1373_v59 }
 0x28d   : > { %v1486_v18 = vmul.f32 2.0, %v1438_v63 }
 0x28e   : > { %v1517_v41 = vsub.f32 %v1485_v51, %v2324_v54  ;;  %v2328_v51 = vld [vmem:[%s2783_s11 + $0x30] sm:$0xff] }
 0x28f   : > { %v1518_v47 = vsub.f32 %v1486_v18, %v2325_v1 }
 0x290   : > { %1663 = vmatmul.f32.gmra.mxu0 %v1517_v41  ;;  %1793 = vmatmul.f32.gmra.mxu2 %v1517_v41 }
 0x291   : > { %1728 = vmatmul.f32.gmra.mxu1 %v1518_v47  ;;  %1858 = vmatmul.f32.gmra.mxu3 %v1518_v47  ;;  %v2329_v47 = vld [vmem:[%s2783_s11 + $0x38] sm:$0xff] }
 0x293   : > { %v1376_v57 = vpop.f32.mrf.mxu2 }
 0x294   : > { %v1441_v2 = vpop.f32.mrf.mxu3  ;;  %v1487_v10 = vmul.f32 2.0, %v1376_v57 }
 0x295   : > { %v1488_v11 = vmul.f32 2.0, %v1441_v2 }
 0x296   : > { %v1519_v4 = vsub.f32 %v1487_v10, %v2326_v24 }
 0x297   : > { %v1520_v59 = vsub.f32 %v1488_v11, %v2327_v12 }
 0x298   : > { %1666 = vmatmul.f32.gmra.mxu0 %v1519_v4  ;;  %1796 = vmatmul.f32.gmra.mxu2 %v1519_v4  ;;  %v2330_v4 = vld [vmem:[%s2783_s11 + $0x40] sm:$0xff] }
 0x299   : > { %1731 = vmatmul.f32.gmra.mxu1 %v1520_v59  ;;  %1861 = vmatmul.f32.gmra.mxu3 %v1520_v59  ;;  %v2331_v59 = vld [vmem:[%s2783_s11 + $0x48] sm:$0xff] }
 0x29b   : > { %v1379_v54 = vpop.f32.mrf.mxu2 }
 0x29c   : > { %v1444_v1 = vpop.f32.mrf.mxu3  ;;  %v1489_v63 = vmul.f32 2.0, %v1379_v54 }
 0x29d   : > { %v1490_v41 = vmul.f32 2.0, %v1444_v1 }
 0x29e   : > { %v1521_v18 = vsub.f32 %v1489_v63, %v2328_v51 }
 0x29f   : > { %v1522_v57 = vsub.f32 %v1490_v41, %v2329_v47 }
 0x2a0   : > { %1669 = vmatmul.f32.gmra.mxu0 %v1521_v18  ;;  %1799 = vmatmul.f32.gmra.mxu2 %v1521_v18  ;;  %v2332_v18 = vld [vmem:[%s2783_s11 + $0x50] sm:$0xff] }
 0x2a1   : > { %1734 = vmatmul.f32.gmra.mxu1 %v1522_v57  ;;  %1864 = vmatmul.f32.gmra.mxu3 %v1522_v57  ;;  %v2333_v57 = vld [vmem:[%s2783_s11 + $0x58] sm:$0xff] }
 0x2a3   : > { %v1382_v2 = vpop.f32.mrf.mxu2 }
 0x2a4   : > { %v1447_v10 = vpop.f32.mrf.mxu3  ;;  %v1491_v11 = vmul.f32 2.0, %v1382_v2 }
 0x2a5   : > { %v1492_v24 = vmul.f32 2.0, %v1447_v10 }
 0x2a6   : > { %v1523_v12 = vsub.f32 %v1491_v11, %v2330_v4 }
 0x2a7   : > { %v1524_v54 = vsub.f32 %v1492_v24, %v2331_v59 }
 0x2a8   : > { %1672 = vmatmul.f32.gmra.mxu0 %v1523_v12  ;;  %1802 = vmatmul.f32.gmra.mxu2 %v1523_v12  ;;  %v2334_v12 = vld [vmem:[%s2783_s11 + $0x60] sm:$0xff] }
 0x2a9   : > { %1737 = vmatmul.f32.gmra.mxu1 %v1524_v54  ;;  %1867 = vmatmul.f32.gmra.mxu3 %v1524_v54  ;;  %v2335_v54 = vld [vmem:[%s2783_s11 + $0x68] sm:$0xff] }
 0x2ab   : > { %v1385_v1 = vpop.f32.mrf.mxu2 }
 0x2ac   : > { %v1450_v63 = vpop.f32.mrf.mxu3  ;;  %v1493_v41 = vmul.f32 2.0, %v1385_v1 }
 0x2ad   : > { %v1494_v51 = vmul.f32 2.0, %v1450_v63 }
 0x2ae   : > { %v1525_v47 = vsub.f32 %v1493_v41, %v2332_v18 }
 0x2af   : > { %v1526_v2 = vsub.f32 %v1494_v51, %v2333_v57 }
 0x2b0   : > { %1675 = vmatmul.f32.gmra.mxu0 %v1525_v47  ;;  %1805 = vmatmul.f32.gmra.mxu2 %v1525_v47  ;;  %v2336_v47 = vld [vmem:[%s2783_s11 + $0x70] sm:$0xff] }
 0x2b1   : > { %1740 = vmatmul.f32.gmra.mxu1 %v1526_v2  ;;  %1870 = vmatmul.f32.gmra.mxu3 %v1526_v2  ;;  %v2337_v2 = vld [vmem:[%s2783_s11 + $0x78] sm:$0xff] }
 0x2b3   : > { %v1388_v10 = vpop.f32.mrf.mxu2 }
 0x2b4   : > { %v1453_v11 = vpop.f32.mrf.mxu3  ;;  %v1495_v24 = vmul.f32 2.0, %v1388_v10 }
 0x2b5   : > { %v1496_v4 = vmul.f32 2.0, %v1453_v11 }
 0x2b6   : > { %v1527_v59 = vsub.f32 %v1495_v24, %v2334_v12 }
 0x2b7   : > { %v1528_v1 = vsub.f32 %v1496_v4, %v2335_v54 }
 0x2b8   : > { %1678 = vmatmul.f32.gmra.mxu0 %v1527_v59  ;;  %1808 = vmatmul.f32.gmra.mxu2 %v1527_v59  ;;  %v2338_v59 = vld [vmem:[%s2783_s11 + $0x80] sm:$0xff] }
 0x2b9   : > { %1743 = vmatmul.f32.gmra.mxu1 %v1528_v1  ;;  %1873 = vmatmul.f32.gmra.mxu3 %v1528_v1  ;;  %v2339_v1 = vld [vmem:[%s2783_s11 + $0x88] sm:$0xff] }
 0x2bb   : > { %v1391_v63 = vpop.f32.mrf.mxu2 }
 0x2bc   : > { %v1456_v41 = vpop.f32.mrf.mxu3  ;;  %v1497_v51 = vmul.f32 2.0, %v1391_v63 }
 0x2bd   : > { %v1498_v18 = vmul.f32 2.0, %v1456_v41 }
 0x2be   : > { %v1529_v57 = vsub.f32 %v1497_v51, %v2336_v47 }
 0x2bf   : > { %v1530_v10 = vsub.f32 %v1498_v18, %v2337_v2 }
 0x2c0   : > { %1681 = vmatmul.f32.gmra.mxu0 %v1529_v57  ;;  %1811 = vmatmul.f32.gmra.mxu2 %v1529_v57  ;;  %v2340_v57 = vld [vmem:[%s2783_s11 + $0x90] sm:$0xff] }
 0x2c1   : > { %1746 = vmatmul.f32.gmra.mxu1 %v1530_v10  ;;  %1876 = vmatmul.f32.gmra.mxu3 %v1530_v10  ;;  %v2341_v10 = vld [vmem:[%s2783_s11 + $0x98] sm:$0xff] }
 0x2c3   : > { %v1394_v11 = vpop.f32.mrf.mxu2 }
 0x2c4   : > { %v1459_v24 = vpop.f32.mrf.mxu3  ;;  %v1499_v4 = vmul.f32 2.0, %v1394_v11 }
 0x2c5   : > { %v1500_v12 = vmul.f32 2.0, %v1459_v24 }
 0x2c6   : > { %v1531_v54 = vsub.f32 %v1499_v4, %v2338_v59 }
 0x2c7   : > { %v1532_v63 = vsub.f32 %v1500_v12, %v2339_v1 }
 0x2c8   : > { %1684 = vmatmul.f32.gmra.mxu0 %v1531_v54  ;;  %1814 = vmatmul.f32.gmra.mxu2 %v1531_v54  ;;  %v2342_v54 = vld [vmem:[%s2783_s11 + $0xa0] sm:$0xff] }
 0x2c9   : > { %1749 = vmatmul.f32.gmra.mxu1 %v1532_v63  ;;  %1879 = vmatmul.f32.gmra.mxu3 %v1532_v63  ;;  %v2343_v63 = vld [vmem:[%s2783_s11 + $0xa8] sm:$0xff] }
 0x2cb   : > { %v1397_v41 = vpop.f32.mrf.mxu2 }
 0x2cc   : > { %v1462_v51 = vpop.f32.mrf.mxu3  ;;  %v1501_v18 = vmul.f32 2.0, %v1397_v41 }
 0x2cd   : > { %v1502_v47 = vmul.f32 2.0, %v1462_v51 }
 0x2ce   : > { %v1533_v2 = vsub.f32 %v1501_v18, %v2340_v57 }
 0x2cf   : > { %v1534_v11 = vsub.f32 %v1502_v47, %v2341_v10 }
 0x2d0   : > { %1687 = vmatmul.f32.gmra.mxu0 %v1533_v2  ;;  %1817 = vmatmul.f32.gmra.mxu2 %v1533_v2  ;;  %v2344_v2 = vld [vmem:[%s2783_s11 + $0xb0] sm:$0xff] }
 0x2d1   : > { %1752 = vmatmul.f32.gmra.mxu1 %v1534_v11  ;;  %1882 = vmatmul.f32.gmra.mxu3 %v1534_v11  ;;  %v2345_v11 = vld [vmem:[%s2783_s11 + $0xb8] sm:$0xff] }
 0x2d3   : > { %v1400_v24 = vpop.f32.mrf.mxu2 }
 0x2d4   : > { %v1465_v4 = vpop.f32.mrf.mxu3  ;;  %v1503_v12 = vmul.f32 2.0, %v1400_v24 }
 0x2d5   : > { %v1504_v59 = vmul.f32 2.0, %v1465_v4 }
 0x2d6   : > { %v1535_v1 = vsub.f32 %v1503_v12, %v2342_v54 }
 0x2d7   : > { %v1536_v41 = vsub.f32 %v1504_v59, %v2343_v63 }
 0x2d8   : > { %1690 = vmatmul.f32.gmra.mxu0 %v1535_v1  ;;  %1820 = vmatmul.f32.gmra.mxu2 %v1535_v1  ;;  %v2346_v1 = vld [vmem:[%s2783_s11 + $0xc0] sm:$0xff] }
 0x2d9   : > { %1755 = vmatmul.f32.gmra.mxu1 %v1536_v41  ;;  %1885 = vmatmul.f32.gmra.mxu3 %v1536_v41  ;;  %v2347_v41 = vld [vmem:[%s2783_s11 + $0xc8] sm:$0xff] }
 0x2db   : > { %v1403_v51 = vpop.f32.mrf.mxu2 }
 0x2dc   : > { %v1468_v18 = vpop.f32.mrf.mxu3  ;;  %v1505_v47 = vmul.f32 2.0, %v1403_v51 }
 0x2dd   : > { %v1506_v57 = vmul.f32 2.0, %v1468_v18 }
 0x2de   : > { %v1537_v10 = vsub.f32 %v1505_v47, %v2344_v2 }
 0x2df   : > { %v1538_v24 = vsub.f32 %v1506_v57, %v2345_v11 }
 0x2e0   : > { %1693 = vmatmul.f32.gmra.mxu0 %v1537_v10  ;;  %1823 = vmatmul.f32.gmra.mxu2 %v1537_v10  ;;  %v2348_v10 = vld [vmem:[%s2783_s11 + $0xd0] sm:$0xff] }
 0x2e1   : > { %1758 = vmatmul.f32.gmra.mxu1 %v1538_v24  ;;  %1888 = vmatmul.f32.gmra.mxu3 %v1538_v24  ;;  %v2349_v24 = vld [vmem:[%s2783_s11 + $0xd8] sm:$0xff] }
 0x2e3   : > { %v1406_v4 = vpop.f32.mrf.mxu2 }
 0x2e4   : > { %v1471_v12 = vpop.f32.mrf.mxu3  ;;  %v1507_v59 = vmul.f32 2.0, %v1406_v4 }
 0x2e5   : > { %v1508_v54 = vmul.f32 2.0, %v1471_v12 }
 0x2e6   : > { %v1539_v63 = vsub.f32 %v1507_v59, %v2346_v1 }
 0x2e7   : > { %v1540_v51 = vsub.f32 %v1508_v54, %v2347_v41 }
 0x2e8   : > { %1696 = vmatmul.f32.gmra.mxu0 %v1539_v63  ;;  %1826 = vmatmul.f32.gmra.mxu2 %v1539_v63  ;;  %v2350_v63 = vld [vmem:[%s2783_s11 + $0xe0] sm:$0xff] }
 0x2e9   : > { %1761 = vmatmul.f32.gmra.mxu1 %v1540_v51  ;;  %1891 = vmatmul.f32.gmra.mxu3 %v1540_v51  ;;  %v2351_v51 = vld [vmem:[%s2783_s11 + $0xe8] sm:$0xff] }
 0x2eb   : > { %v1409_v18 = vpop.f32.mrf.mxu2 }
 0x2ec   : > { %v1474_v47 = vpop.f32.mrf.mxu3  ;;  %v1509_v57 = vmul.f32 2.0, %v1409_v18 }
 0x2ed   : > { %v1510_v2 = vmul.f32 2.0, %v1474_v47 }
 0x2ee   : > { %v1541_v11 = vsub.f32 %v1509_v57, %v2348_v10 }
 0x2ef   : > { %v1542_v4 = vsub.f32 %v1510_v2, %v2349_v24  ;;  %v3468_v24 = vpop.f32.mrf.mxu0 }
 0x2f0   : > { %1699 = vmatmul.f32.gmra.mxu0 %v1541_v11  ;;  %1829 = vmatmul.f32.gmra.mxu2 %v1541_v11  ;;  %v716_v11 = vld [vmem:[%s3724_s3] sm:$0x3] }
 0x2f1   : > { %1764 = vmatmul.f32.gmra.mxu1 %v1542_v4  ;;  %1894 = vmatmul.f32.gmra.mxu3 %v1542_v4  ;;  %v3470_v4 = vpop.f32.mrf.mxu1 }
 0x2f3   : > { %v1412_v12 = vpop.f32.mrf.mxu2 }
 0x2f4   : > { %v1477_v59 = vpop.f32.mrf.mxu3  ;;  %v1511_v54 = vmul.f32 2.0, %v1412_v12  ;;  %v2352_v12 = vld [vmem:[%s2783_s11 + $0xf0] sm:$0xff] }
 0x2f5   : > { %v1512_v1 = vmul.f32 2.0, %v1477_v59 }
 0x2f6   : > { %v1543_v41 = vsub.f32 %v1511_v54, %v2350_v63  ;;  %v2353_v54 = vld [vmem:[%s2783_s11 + $0xf8] sm:$0xff]  ;;  %v475_v63 = vadd.f32 %v2963_v33, %v2961_v32  ;;  %v3483_v32 = vperm.slane %v716_v11, 1  ;;  %v478_v33 = vadd.f32 %v2974_v36, %v2972_v35 }
 0x2f7   : > { %v1544_v18 = vsub.f32 %v1512_v1, %v2351_v51  ;;  %v1112_v51 = vadd.f32 %v3279_v60, %v3277_v6  ;;  %v1115_v60 = vadd.f32 %v3295_v49, %v3293_v44  ;;  %v608_v44 = vadd.f32 %v3124_v26, %v3122_v25 }
 0x2f8   : > { %1702 = vmatmul.f32.gmra.mxu0 %v1543_v41  ;;  %1832 = vmatmul.f32.gmra.mxu2 %v1543_v41  ;;  %v3476_v41 = vperm.slane %v716_v11, 0 }
 0x2f9   : > { %1767 = vmatmul.f32.gmra.mxu1 %v1544_v18  ;;  %1897 = vmatmul.f32.gmra.mxu3 %v1544_v18 }
 0x2fa   : > { %v722_v18 = vadd.f32 %v3476_v41, %v475_v63 }
 0x2fb   : > { %v1415_v47 = vpop.f32.mrf.mxu2 }
 0x2fc   : > { %v1480_v57 = vpop.f32.mrf.mxu3  ;;  %v1513_v2 = vmul.f32 2.0, %v1415_v47 }
 0x2fd   : > { %v1514_v10 = vmul.f32 2.0, %v1480_v57 }
 0x2fe   : > { %v1545_v59 = vsub.f32 %v1513_v2, %v2352_v12  ;;  %v1289_v2 = vadd.f32 %v1112_v51, %v722_v18  ;;  %v481_v51 = vadd.f32 %v2985_v39, %v2983_v38 }
 0x2ff   : > { %v1546_v1 = vsub.f32 %v1514_v10, %v2353_v54  ;;  %v605_v10 = vadd.f32 %v3111_v21, %v3109_v5  ;;  %v724_v5 = vadd.f32 %v3476_v41, %v478_v33 }
 0x300   : > { %1705 = vmatmul.f32.gmra.mxu0 %v1545_v59  ;;  %1835 = vmatmul.f32.gmra.mxu2 %v1545_v59  ;;  %v1242_v59 = vadd.f32 %v3275_v9, %v3273_v46 }
 0x301   : > { %1770 = vmatmul.f32.gmra.mxu1 %v1546_v1  ;;  %1900 = vmatmul.f32.gmra.mxu3 %v1546_v1  ;;  %v723_v6 = vadd.f32 %v3483_v32, %v605_v10  ;;  %v1291_v46 = vadd.f32 %v1115_v60, %v724_v5 }
 0x303   : > { %v1290_v35 = vadd.f32 %v1242_v59, %v723_v6 }
 0x305   : > { %v1661_v47 = vpop.f32.mrf.mxu0 }
 0x306   : > { %v1726_v57 = vpop.f32.mrf.mxu1 }
 0x307   : > { %v1727_v12 = vadd.f32 %v1726_v57, %v1661_v47  ;;  %v1245_v47 = vadd.f32 %v3287_v48, %v3285_v42  ;;  %v1118_v57 = vadd.f32 %v3311_v56, %v3309_v53  ;;  %v3827_v42 = vld [vmem:[#allocation49_spill] sm:$0xff]  ;;  %v3828_v53 = vld [vmem:[#allocation23_spill] sm:$0xff]  ;;  %v3829_v56 = vld [vmem:[#allocation24_spill] sm:$0xff] }
 0x308   : > { %v611_v48 = vadd.f32 %v3827_v42, %v3135_v3  ;;  %v484_v6 = vadd.f32 %v3829_v56, %v3828_v53 }
 0x309   : > { %v1904_v54 = vadd.f32 %v1727_v12, %v1289_v2  ;;  %v725_v2 = vadd.f32 %v3483_v32, %v608_v44  ;;  %v726_v12 = vadd.f32 %v3476_v41, %v481_v51 }
 0x30b   : > { %2000 = vst [vmem:[%s3492_s5] sm:$0xff] %v1904_v54  ;;  %v1791_v21 = vpop.f32.mrf.mxu2  ;;  %v1292_v10 = vadd.f32 %v1245_v47, %v725_v2  ;;  %v1293_v54 = vadd.f32 %v1118_v57, %v726_v12  ;;  %v1251_v12 = vadd.f32 %v3319_v16, %v3317_v61  ;;  %v3834_v61 = vld [vmem:[#allocation52_spill] sm:$0xff]  ;;  %v3835_v16 = vld [vmem:[#allocation53_spill] sm:$0xff] }
 0x30c   : > { %v1856_v11 = vpop.f32.mrf.mxu3  ;;  %v617_v53 = vadd.f32 %v3835_v16, %v3834_v61  ;;  %v1260_v61 = vadd.f32 %v3349_v23, %v3347_v22  ;;  %v1133_v16 = vadd.f32 %v3369_v55, %v3367_v43  ;;  %v3846_v22 = vld [vmem:[#allocation58_spill] sm:$0xff]  ;;  %v3847_v23 = vld [vmem:[#allocation59_spill] sm:$0xff]  ;;  %v3848_v43 = vld [vmem:[#allocation33_spill] sm:$0xff] }
 0x30d   : > { %v1857_v36 = vadd.f32 %v1856_v11, %v1791_v21  ;;  %v1664_v1 = vpop.f32.mrf.mxu0  ;;  %v1248_v21 = vadd.f32 %v3303_v50, %v3301_v52  ;;  %v1121_v11 = vadd.f32 %v3325_v30, %v3323_v17  ;;  %v3830_v52 = vld [vmem:[#allocation50_spill] sm:$0xff]  ;;  %v3831_v50 = vld [vmem:[#allocation51_spill] sm:$0xff]  ;;  %v3832_v17 = vld [vmem:[#allocation25_spill] sm:$0xff] }
 0x30e   : > { %v1729_v63 = vpop.f32.mrf.mxu1  ;;  %v3833_v30 = vld [vmem:[#allocation26_spill] sm:$0xff] }
 0x30f   : > { %v1730_v9 = vadd.f32 %v1729_v63, %v1664_v1  ;;  %v1905_v49 = vadd.f32 %v1857_v36, %v1290_v35  ;;  %v727_v35 = vadd.f32 %v3483_v32, %v611_v48  ;;  %v728_v36 = vadd.f32 %v3476_v41, %v484_v6  ;;  %v3849_v55 = vld [vmem:[#allocation34_spill] sm:$0xff] }
 0x310   : > { %v487_v57 = vadd.f32 %v3833_v30, %v3832_v17  ;;  %v1257_v17 = vadd.f32 %v3339_v13, %v3337_v29  ;;  %v1130_v30 = vadd.f32 %v3359_v7, %v3357_v62  ;;  %v3842_v29 = vld [vmem:[#allocation56_spill] sm:$0xff]  ;;  %v3843_v13 = vld [vmem:[#allocation57_spill] sm:$0xff]  ;;  %v3844_v62 = vld [vmem:[#allocation31_spill] sm:$0xff] }
 0x311   : > { %v1906_v18 = vadd.f32 %v1730_v9, %v1291_v46  ;;  %2001 = vst [vmem:[%s3492_s5 + $0x8] sm:$0xff] %v1905_v49  ;;  %v1294_v63 = vadd.f32 %v1248_v21, %v727_v35  ;;  %v1295_v49 = vadd.f32 %v1121_v11, %v728_v36  ;;  %v1254_v21 = vadd.f32 %v3329_v14, %v3327_v31  ;;  %v3838_v31 = vld [vmem:[#allocation54_spill] sm:$0xff]  ;;  %v3839_v14 = vld [vmem:[#allocation55_spill] sm:$0xff]  ;;  %v3845_v7 = vld [vmem:[#allocation32_spill] sm:$0xff] }
 0x312   : > { %v1127_v11 = vadd.f32 %v3345_v20, %v3343_v34  ;;  %v731_v35 = vadd.f32 %v3483_v32, %v617_v53  ;;  %v3840_v34 = vld [vmem:[#allocation29_spill] sm:$0xff]  ;;  %v3841_v20 = vld [vmem:[#allocation30_spill] sm:$0xff] }
 0x313   : > { %2002 = vst [vmem:[%s3492_s5 + $0x10] sm:$0xff] %v1906_v18  ;;  %v1794_v25 = vpop.f32.mrf.mxu2  ;;  %v614_v18 = vadd.f32 %v3831_v50, %v3830_v52  ;;  %v620_v52 = vadd.f32 %v3839_v14, %v3838_v31 }
 0x314   : > { %v1859_v26 = vpop.f32.mrf.mxu3 }
 0x315   : > { %v1860_v33 = vadd.f32 %v1859_v26, %v1794_v25  ;;  %v1667_v38 = vpop.f32.mrf.mxu0  ;;  %v1124_v25 = vadd.f32 %v3335_v28, %v3333_v15  ;;  %v729_v26 = vadd.f32 %v3483_v32, %v614_v18  ;;  %v3836_v15 = vld [vmem:[#allocation27_spill] sm:$0xff]  ;;  %v3837_v28 = vld [vmem:[#allocation28_spill] sm:$0xff]  ;;  %v493_v18 = vadd.f32 %v3841_v20, %v3840_v34 }
 0x316   : > { %v1732_v39 = vpop.f32.mrf.mxu1  ;;  %v490_v6 = vadd.f32 %v3837_v28, %v3836_v15 }
 0x317   : > { %v1733_v59 = vadd.f32 %v1732_v39, %v1667_v38  ;;  %v1907_v60 = vadd.f32 %v1860_v33, %v1292_v10  ;;  %v730_v10 = vadd.f32 %v3476_v41, %v487_v57  ;;  %v1296_v39 = vadd.f32 %v1251_v12, %v729_v26 }
 0x318   : > { %v732_v36 = vadd.f32 %v3476_v41, %v490_v6  ;;  %v733_v57 = vadd.f32 %v3483_v32, %v620_v52 }
 0x319   : > { %v1908_v5 = vadd.f32 %v1733_v59, %v1293_v54  ;;  %2003 = vst [vmem:[%s3492_s5 + $0x18] sm:$0xff] %v1907_v60  ;;  %v1297_v48 = vadd.f32 %v1124_v25, %v730_v10 }
 0x31a   : > { %v1300_v26 = vadd.f32 %v1257_v17, %v733_v57 }
 0x31b   : > { %2004 = vst [vmem:[%s3492_s5 + $0x20] sm:$0xff] %v1908_v5  ;;  %v1797_v3 = vpop.f32.mrf.mxu2 }
 0x31c   : > { %v1862_v1 = vpop.f32.mrf.mxu3 }
 0x31d   : > { %v1863_v46 = vadd.f32 %v1862_v1, %v1797_v3  ;;  %v1670_v9 = vpop.f32.mrf.mxu0 }
 0x31e   : > { %v1735_v44 = vpop.f32.mrf.mxu1 }
 0x31f   : > { %v1736_v51 = vadd.f32 %v1735_v44, %v1670_v9  ;;  %v1909_v47 = vadd.f32 %v1863_v46, %v1294_v63  ;;  %v1298_v63 = vadd.f32 %v1254_v21, %v731_v35 }
 0x321   : > { %v1910_v2 = vadd.f32 %v1736_v51, %v1295_v49  ;;  %2005 = vst [vmem:[%s3492_s5 + $0x28] sm:$0xff] %v1909_v47  ;;  %v1299_v49 = vadd.f32 %v1127_v11, %v732_v36 }
 0x323   : > { %2006 = vst [vmem:[%s3492_s5 + $0x30] sm:$0xff] %v1910_v2  ;;  %v1800_v33 = vpop.f32.mrf.mxu2  ;;  %v734_v2 = vadd.f32 %v3476_v41, %v493_v18 }
 0x324   : > { %v1865_v38 = vpop.f32.mrf.mxu3 }
 0x325   : > { %v1866_v54 = vadd.f32 %v1865_v38, %v1800_v33  ;;  %v1673_v59 = vpop.f32.mrf.mxu0 }
 0x326   : > { %v1738_v42 = vpop.f32.mrf.mxu1 }
 0x327   : > { %v1739_v60 = vadd.f32 %v1738_v42, %v1673_v59  ;;  %v1911_v56 = vadd.f32 %v1866_v54, %v1296_v39  ;;  %v1301_v39 = vadd.f32 %v1130_v30, %v734_v2  ;;  %v623_v59 = vadd.f32 %v3843_v13, %v3842_v29 }
 0x329   : > { %v1912_v5 = vadd.f32 %v1739_v60, %v1297_v48  ;;  %2007 = vst [vmem:[%s3492_s5 + $0x38] sm:$0xff] %v1911_v56  ;;  %v496_v48 = vadd.f32 %v3845_v7, %v3844_v62  ;;  %v735_v53 = vadd.f32 %v3483_v32, %v623_v59 }
 0x32b   : > { %2008 = vst [vmem:[%s3492_s5 + $0x40] sm:$0xff] %v1912_v5  ;;  %v1803_v3 = vpop.f32.mrf.mxu2  ;;  %v736_v56 = vadd.f32 %v3476_v41, %v496_v48  ;;  %v1302_v6 = vadd.f32 %v1260_v61, %v735_v53  ;;  %v3859_v53 = vld [vmem:[#allocation62_spill] sm:$0xff] }
 0x32c   : > { %v1868_v1 = vpop.f32.mrf.mxu3 }
 0x32d   : > { %v1869_v46 = vadd.f32 %v1868_v1, %v1803_v3  ;;  %v1676_v9 = vpop.f32.mrf.mxu0  ;;  %v1303_v35 = vadd.f32 %v1133_v16, %v736_v56  ;;  %v626_v3 = vadd.f32 %v3847_v23, %v3846_v22  ;;  %v3860_v56 = vld [vmem:[#allocation63_spill] sm:$0xff] }
 0x32e   : > { %v1741_v44 = vpop.f32.mrf.mxu1 }
 0x32f   : > { %v1742_v51 = vadd.f32 %v1741_v44, %v1676_v9  ;;  %v1913_v50 = vadd.f32 %v1869_v46, %v1298_v63  ;;  %v499_v63 = vadd.f32 %v3849_v55, %v3848_v43  ;;  %v1263_v9 = vadd.f32 %v3355_v27, %v3353_v37  ;;  %v3850_v44 = vld [vmem:[#allocation78_spill] sm:$0xff]  ;;  %v3852_v37 = vld [vmem:[#allocation60_spill] sm:$0xff]  ;;  %v3853_v27 = vld [vmem:[#allocation61_spill] sm:$0xff] }
 0x330   : > { %v737_v31 = vadd.f32 %v3483_v32, %v626_v3  ;;  %v629_v57 = vadd.f32 %v3853_v27, %v3852_v37  ;;  %v3865_v55 = vld [vmem:[#allocation77_spill] sm:$0xff] }
 0x331   : > { %v1914_v47 = vadd.f32 %v1742_v51, %v1299_v49  ;;  %2009 = vst [vmem:[%s3492_s5 + $0x48] sm:$0xff] %v1913_v50  ;;  %v3851_v49 = vld [vmem:[#allocation79_spill] sm:$0xff]  ;;  %v738_v14 = vadd.f32 %v3476_v41, %v499_v63 }
 0x332   : > { %v1136_v51 = vadd.f32 %v3851_v49, %v3850_v44  ;;  %v1304_v34 = vadd.f32 %v1263_v9, %v737_v31  ;;  %v3866_v31 = vld [vmem:[#allocation64_spill] sm:$0xff] }
 0x333   : > { %2010 = vst [vmem:[%s3492_s5 + $0x50] sm:$0xff] %v1914_v47  ;;  %v1806_v12 = vpop.f32.mrf.mxu2 }
 0x334   : > { %v1871_v25 = vpop.f32.mrf.mxu3  ;;  %v1305_v17 = vadd.f32 %v1136_v51, %v738_v14  ;;  %v3867_v14 = vld [vmem:[#allocation65_spill] sm:$0xff] }
 0x335   : > { %v1872_v10 = vadd.f32 %v1871_v25, %v1806_v12  ;;  %v1679_v33 = vpop.f32.mrf.mxu0  ;;  %v3854_v12 = vld [vmem:[#allocation35_spill] sm:$0xff]  ;;  %v3855_v25 = vld [vmem:[#allocation36_spill] sm:$0xff] }
 0x336   : > { %v1744_v38 = vpop.f32.mrf.mxu1 }
 0x337   : > { %v1745_v54 = vadd.f32 %v1744_v38, %v1679_v33  ;;  %v1915_v42 = vadd.f32 %v1872_v10, %v1300_v26  ;;  %v502_v26 = vadd.f32 %v3855_v25, %v3854_v12  ;;  %v3856_v33 = vld [vmem:[#allocation81_spill] sm:$0xff]  ;;  %v3857_v38 = vld [vmem:[#allocation82_spill] sm:$0xff]  ;;  %v3872_v25 = vld [vmem:[#allocation80_spill] sm:$0xff] }
 0x339   : > { %v1916_v60 = vadd.f32 %v1745_v54, %v1301_v39  ;;  %2011 = vst [vmem:[%s3492_s5 + $0x58] sm:$0xff] %v1915_v42  ;;  %v1139_v39 = vadd.f32 %v3857_v38, %v3856_v33  ;;  %v739_v54 = vadd.f32 %v3483_v32, %v629_v57  ;;  %v740_v29 = vadd.f32 %v3476_v41, %v502_v26  ;;  %v3858_v42 = vld [vmem:[#allocation76_spill] sm:$0xff] }
 0x33b   : > { %2012 = vst [vmem:[%s3492_s5 + $0x60] sm:$0xff] %v1916_v60  ;;  %v1809_v15 = vpop.f32.mrf.mxu2  ;;  %v1306_v62 = vadd.f32 %v3858_v42, %v739_v54  ;;  %v1307_v61 = vadd.f32 %v1139_v39, %v740_v29  ;;  %v3873_v29 = vld [vmem:[#allocation66_spill] sm:$0xff] }
 0x33c   : > { %v1874_v28 = vpop.f32.mrf.mxu3 }
 0x33d   : > { %v1875_v5 = vadd.f32 %v1874_v28, %v1809_v15  ;;  %v1682_v21 = vpop.f32.mrf.mxu0  ;;  %v632_v15 = vadd.f32 %v3860_v56, %v3859_v53 }
 0x33e   : > { %v1747_v11 = vpop.f32.mrf.mxu1 }
 0x33f   : > { %v1748_v36 = vadd.f32 %v1747_v11, %v1682_v21  ;;  %v1917_v1 = vadd.f32 %v1875_v5, %v1302_v6  ;;  %v3861_v6 = vld [vmem:[#allocation37_spill] sm:$0xff]  ;;  %v3862_v5 = vld [vmem:[#allocation38_spill] sm:$0xff]  ;;  %v741_v23 = vadd.f32 %v3483_v32, %v632_v15 }
 0x340   : > { %v505_v21 = vadd.f32 %v3862_v5, %v3861_v6 }
 0x341   : > { %v1918_v46 = vadd.f32 %v1748_v36, %v1303_v35  ;;  %2013 = vst [vmem:[%s3492_s5 + $0x68] sm:$0xff] %v1917_v1  ;;  %v3863_v35 = vld [vmem:[#allocation85_spill] sm:$0xff]  ;;  %v3864_v36 = vld [vmem:[#allocation86_spill] sm:$0xff]  ;;  %v1308_v63 = vadd.f32 %v3865_v55, %v741_v23 }
 0x342   : > { %v1142_v22 = vadd.f32 %v3864_v36, %v3863_v35  ;;  %v742_v3 = vadd.f32 %v3476_v41, %v505_v21  ;;  %v3879_v23 = vld [vmem:[#allocation69_spill] sm:$0xff] }
 0x343   : > { %2014 = vst [vmem:[%s3492_s5 + $0x70] sm:$0xff] %v1918_v46  ;;  %v1812_v52 = vpop.f32.mrf.mxu2 }
 0x344   : > { %v1877_v50 = vpop.f32.mrf.mxu3  ;;  %v1309_v49 = vadd.f32 %v1142_v22, %v742_v3  ;;  %v3878_v22 = vld [vmem:[#allocation68_spill] sm:$0xff] }
 0x345   : > { %v1878_v20 = vadd.f32 %v1877_v50, %v1812_v52  ;;  %v1685_v18 = vpop.f32.mrf.mxu0  ;;  %v635_v52 = vadd.f32 %v3867_v14, %v3866_v31  ;;  %v641_v3 = vadd.f32 %v3879_v23, %v3878_v22 }
 0x346   : > { %v1750_v47 = vpop.f32.mrf.mxu1 }
 0x347   : > { %v1751_v30 = vadd.f32 %v1750_v47, %v1685_v18  ;;  %v1919_v2 = vadd.f32 %v1878_v20, %v1304_v34  ;;  %v3868_v34 = vld [vmem:[#allocation39_spill] sm:$0xff]  ;;  %v3869_v20 = vld [vmem:[#allocation40_spill] sm:$0xff]  ;;  %v743_v27 = vadd.f32 %v3483_v32, %v635_v52 }
 0x348   : > { %v508_v18 = vadd.f32 %v3869_v20, %v3868_v34 }
 0x349   : > { %v1920_v10 = vadd.f32 %v1751_v30, %v1305_v17  ;;  %2015 = vst [vmem:[%s3492_s5 + $0x78] sm:$0xff] %v1919_v2  ;;  %v3870_v17 = vld [vmem:[#allocation88_spill] sm:$0xff]  ;;  %v3871_v30 = vld [vmem:[#allocation89_spill] sm:$0xff]  ;;  %v1310_v26 = vadd.f32 %v3872_v25, %v743_v27 }
 0x34a   : > { %v1145_v37 = vadd.f32 %v3871_v30, %v3870_v17  ;;  %v744_v57 = vadd.f32 %v3476_v41, %v508_v18  ;;  %v3883_v18 = vld [vmem:[#allocation70_spill] sm:$0xff] }
 0x34b   : > { %2016 = vst [vmem:[%s3492_s5 + $0x80] sm:$0xff] %v1920_v10  ;;  %v1815_v13 = vpop.f32.mrf.mxu2  ;;  %v3886_v30 = vld [vmem:[#allocation46_spill] sm:$0xff] }
 0x34c   : > { %v1880_v59 = vpop.f32.mrf.mxu3  ;;  %v1311_v39 = vadd.f32 %v1145_v37, %v744_v57  ;;  %v1154_v57 = vadd.f32 %v3427_v58, %v3425_v8  ;;  %v3890_v58 = vld [vmem:[#allocation47_spill] sm:$0xff] }
 0x34d   : > { %v1881_v7 = vadd.f32 %v1880_v59, %v1815_v13  ;;  %v1688_v48 = vpop.f32.mrf.mxu0  ;;  %v3874_v13 = vld [vmem:[#allocation67_spill] sm:$0xff] }
 0x34e   : > { %v1753_v60 = vpop.f32.mrf.mxu1  ;;  %v638_v59 = vadd.f32 %v3874_v13, %v3873_v29 }
 0x34f   : > { %v1754_v16 = vadd.f32 %v1753_v60, %v1688_v48  ;;  %v1921_v28 = vadd.f32 %v1881_v7, %v1306_v62  ;;  %v3875_v62 = vld [vmem:[#allocation41_spill] sm:$0xff]  ;;  %v3876_v7 = vld [vmem:[#allocation42_spill] sm:$0xff] }
 0x350   : > { %v511_v48 = vadd.f32 %v3876_v7, %v3875_v62  ;;  %v3891_v7 = vld [vmem:[#allocation48_spill] sm:$0xff] }
 0x351   : > { %v1922_v11 = vadd.f32 %v1754_v16, %v1307_v61  ;;  %2017 = vst [vmem:[%s3492_s5 + $0x88] sm:$0xff] %v1921_v28  ;;  %v1148_v61 = vadd.f32 %v3413_v19, %v3411_v0  ;;  %v745_v16 = vadd.f32 %v3483_v32, %v638_v59  ;;  %v3877_v28 = vld [vmem:[#allocation83_spill] sm:$0xff]  ;;  %v3888_v59 = vld [vmem:[#allocation72_spill] sm:$0xff] }
 0x352   : > { %v746_v53 = vadd.f32 %v3476_v41, %v511_v48  ;;  %v3880_v19 = vld [vmem:[#allocation43_spill] sm:$0xff]  ;;  %v520_v48 = vadd.f32 %v3891_v7, %v3890_v58 }
 0x353   : > { %2018 = vst [vmem:[%s3492_s5 + $0x90] sm:$0xff] %v1922_v11  ;;  %v1818_v1 = vpop.f32.mrf.mxu2  ;;  %v1312_v6 = vadd.f32 %v3877_v28, %v745_v16  ;;  %v3893_v16 = vld [vmem:[#allocation92_spill] sm:$0xff] }
 0x354   : > { %v1883_v43 = vpop.f32.mrf.mxu3  ;;  %v1313_v35 = vadd.f32 %v1148_v61, %v746_v53  ;;  %v3892_v61 = vld [vmem:[#allocation91_spill] sm:$0xff] }
 0x355   : > { %v1884_v46 = vadd.f32 %v1883_v43, %v1818_v1  ;;  %v1691_v9 = vpop.f32.mrf.mxu0  ;;  %v3881_v1 = vld [vmem:[#allocation44_spill] sm:$0xff]  ;;  %v1157_v53 = vadd.f32 %v3893_v16, %v3892_v61 }
 0x356   : > { %v1756_v44 = vpop.f32.mrf.mxu1  ;;  %v514_v43 = vadd.f32 %v3881_v1, %v3880_v19 }
 0x357   : > { %v1757_v51 = vadd.f32 %v1756_v44, %v1691_v9  ;;  %v1923_v50 = vadd.f32 %v1884_v46, %v1308_v63  ;;  %v1151_v63 = vadd.f32 %v3419_v40, %v3417_v45  ;;  %v747_v46 = vadd.f32 %v3483_v32, %v641_v3  ;;  %v3885_v40 = vld [vmem:[#allocation45_spill] sm:$0xff]  ;;  %v3895_v3 = vld [vmem:[#allocation74_spill] sm:$0xff] }
 0x358   : > { %v748_v9 = vadd.f32 %v3476_v41, %v514_v43  ;;  %v517_v37 = vadd.f32 %v3886_v30, %v3885_v40 }
 0x359   : > { %v1924_v47 = vadd.f32 %v1757_v51, %v1309_v49  ;;  %2019 = vst [vmem:[%s3492_s5 + $0x98] sm:$0xff] %v1923_v50  ;;  %v3882_v51 = vld [vmem:[#allocation84_spill] sm:$0xff] }
 0x35a   : > { %v1314_v31 = vadd.f32 %v3882_v51, %v747_v46  ;;  %v1315_v34 = vadd.f32 %v1151_v63, %v748_v9 }
 0x35b   : > { %2020 = vst [vmem:[%s3492_s5 + $0xa0] sm:$0xff] %v1924_v47  ;;  %v1821_v2 = vpop.f32.mrf.mxu2  ;;  %v3884_v47 = vld [vmem:[#allocation71_spill] sm:$0xff] }
 0x35c   : > { %v1886_v12 = vpop.f32.mrf.mxu3  ;;  %v644_v17 = vadd.f32 %v3884_v47, %v3883_v18 }
 0x35d   : > { %v1887_v10 = vadd.f32 %v1886_v12, %v1821_v2  ;;  %v1694_v33 = vpop.f32.mrf.mxu0  ;;  %v750_v12 = vadd.f32 %v3476_v41, %v517_v37 }
 0x35e   : > { %v1759_v38 = vpop.f32.mrf.mxu1  ;;  %v749_v2 = vadd.f32 %v3483_v32, %v644_v17 }
 0x35f   : > { %v1760_v54 = vadd.f32 %v1759_v38, %v1694_v33  ;;  %v1925_v42 = vadd.f32 %v1887_v10, %v1310_v26  ;;  %v3887_v10 = vld [vmem:[#allocation87_spill] sm:$0xff]  ;;  %v1317_v29 = vadd.f32 %v1154_v57, %v750_v12 }
 0x360   : > { %v1316_v33 = vadd.f32 %v3887_v10, %v749_v2 }
 0x361   : > { %v1926_v60 = vadd.f32 %v1760_v54, %v1311_v39  ;;  %2021 = vst [vmem:[%s3492_s5 + $0xa8] sm:$0xff] %v1925_v42  ;;  %v3889_v42 = vld [vmem:[#allocation73_spill] sm:$0xff] }
 0x362   : > { %v647_v62 = vadd.f32 %v3889_v42, %v3888_v59 }
 0x363   : > { %2022 = vst [vmem:[%s3492_s5 + $0xb0] sm:$0xff] %v1926_v60  ;;  %v1824_v56 = vpop.f32.mrf.mxu2 }
 0x364   : > { %v1889_v15 = vpop.f32.mrf.mxu3 }
 0x365   : > { %v1890_v5 = vadd.f32 %v1889_v15, %v1824_v56  ;;  %v1697_v21 = vpop.f32.mrf.mxu0  ;;  %v751_v56 = vadd.f32 %v3483_v32, %v647_v62  ;;  %v752_v15 = vadd.f32 %v3476_v41, %v520_v48  ;;  %v1287_v41 = vadd.f32 %v3470_v4, %v3468_v24 }
 0x366   : > { %v1762_v11 = vpop.f32.mrf.mxu1 }
 0x367   : > { %v1763_v36 = vadd.f32 %v1762_v11, %v1697_v21  ;;  %v1927_v0 = vadd.f32 %v1890_v5, %v1312_v6  ;;  %v3894_v5 = vld [vmem:[#allocation90_spill] sm:$0xff]  ;;  %v1319_v22 = vadd.f32 %v1157_v53, %v752_v15 }
 0x368   : > { %v1318_v21 = vadd.f32 %v3894_v5, %v751_v56 }
 0x369   : > { %v1928_v55 = vadd.f32 %v1763_v36, %v1313_v35  ;;  %2023 = vst [vmem:[%s3492_s5 + $0xb8] sm:$0xff] %v1927_v0  ;;  %v3896_v0 = vld [vmem:[#allocation75_spill] sm:$0xff] }
 0x36a   : > { %v650_v19 = vadd.f32 %v3896_v0, %v3895_v3 }
 0x36b   : > { %2024 = vst [vmem:[%s3492_s5 + $0xc0] sm:$0xff] %v1928_v55  ;;  %v1827_v44 = vpop.f32.mrf.mxu2 }
 0x36c   : > { %v1892_v49 = vpop.f32.mrf.mxu3  ;;  %v753_v55 = vadd.f32 %v3483_v32, %v650_v19 }
 0x36d   : > { %v1893_v14 = vadd.f32 %v1892_v49, %v1827_v44  ;;  %v1700_v52 = vpop.f32.mrf.mxu0 }
 0x36e   : > { %v1765_v50 = vpop.f32.mrf.mxu1  ;;  %v1320_v9 = vadd.f32 %v1287_v41, %v753_v55 }
 0x36f   : > { %v1766_v20 = vadd.f32 %v1765_v50, %v1700_v52  ;;  %v1929_v45 = vadd.f32 %v1893_v14, %v1314_v31 }
 0x371   : > { %v1930_v27 = vadd.f32 %v1766_v20, %v1315_v34  ;;  %2025 = vst [vmem:[%s3492_s5 + $0xc8] sm:$0xff] %v1929_v45 }
 0x373   : > { %2026 = vst [vmem:[%s3492_s5 + $0xd0] sm:$0xff] %v1930_v27  ;;  %v1830_v25 = vpop.f32.mrf.mxu2 }
 0x374   : > { %v1895_v26 = vpop.f32.mrf.mxu3 }
 0x375   : > { %v1896_v38 = vadd.f32 %v1895_v26, %v1830_v25  ;;  %v1703_v39 = vpop.f32.mrf.mxu0 }
 0x376   : > { %v1768_v54 = vpop.f32.mrf.mxu1 }
 0x377   : > { %v1769_v13 = vadd.f32 %v1768_v54, %v1703_v39  ;;  %v1931_v8 = vadd.f32 %v1896_v38, %v1316_v33 }
 0x379   : > { %v1932_v60 = vadd.f32 %v1769_v13, %v1317_v29  ;;  %2027 = vst [vmem:[%s3492_s5 + $0xd8] sm:$0xff] %v1931_v8 }
 0x37b   : > { %2028 = vst [vmem:[%s3492_s5 + $0xe0] sm:$0xff] %v1932_v60  ;;  %v1833_v28 = vpop.f32.mrf.mxu2 }
 0x37c   : > { %v1898_v6 = vpop.f32.mrf.mxu3 }
 0x37d   : > { %v1899_v11 = vadd.f32 %v1898_v6, %v1833_v28  ;;  %v1706_v35 = vpop.f32.mrf.mxu0 }
 0x37e   : > { %v1771_v36 = vpop.f32.mrf.mxu1 }
 0x37f   : > { %v1772_v23 = vadd.f32 %v1771_v36, %v1706_v35  ;;  %v1933_v1 = vadd.f32 %v1899_v11, %v1318_v21 }
 0x381   : > { %v1934_v43 = vadd.f32 %v1772_v23, %v1319_v22  ;;  %2029 = vst [vmem:[%s3492_s5 + $0xe8] sm:$0xff] %v1933_v1 }
 0x383   : > { %2030 = vst [vmem:[%s3492_s5 + $0xf0] sm:$0xff] %v1934_v43  ;;  %v1836_v63 = vpop.f32.mrf.mxu2 }
 0x384   : > { %v1901_v46 = vpop.f32.mrf.mxu3 }
 0x385   : > { %v1902_v44 = vadd.f32 %v1901_v46, %v1836_v63 }
 0x387   : > { %v1935_v49 = vadd.f32 %v1902_v44, %v1320_v9 }
 0x389   : > { %2031 = vst [vmem:[%s3492_s5 + $0xf8] sm:$0xff] %v1935_v49 }
 0x38a   : > { %2471 = shalt.err (!%p2468_p9)
}
 0x38b   : > { %s2582_s17 = smov 256   ;;  %s2583_s11 = smov 512  }
 0x38c   : > { %s2584_s26 = smov 16  }
 0x38d   : > { %2204 = dma.vmem_to_hbm [thread:$0]  (%p2753_p10), %s2048_s14, 4096, %s2050_s18, %s2033_s2, %s2582_s17, %s2583_s11, %s2584_s26  }
 0x38e PF: > { %s3898_s28 = sld [smem:[#allocation14_spill]]  ;;  %p2224_p11 = scmp.ge.s32.totalorder %s2574_s25, 2 }
 0x390   : > { %p2218_p12 = pnand %p2224_p11, %p2680_p6 }
 0x392   : > { %p2219_p1 = pneg %p2218_p12 }
 0x394   : > { %s2064_s15 = sand.u32 1, %s3898_s28  }
 0x395   : > { %s2065_s9 = scalar_lea.sflag [#allocation5], %s2064_s15 }
 0x396   : > { %2529 = dma.done.wait (%p2219_p1), %s2065_s9, 4096  }
 0x397   : > { %2531 = vsyncadd (%p2219_p1), %s2065_s9, 4294963200  ;;  %s23_s25 = sadd.s32 1, %s2574_s25   ;;  %s3900_s10 = sld [smem:[#allocation15_spill]] }
 0x398   : > { %p20_p3 = scmp.ge.s32.totalorder %s23_s25, 6   ;;  %s3901_s17 = sld [smem:[#allocation21_spill]] }
 0x399   : > { %s3902_s21 = sld [smem:[#allocation16_spill]]  ;;  %s3906_s15 = smov %s2538_s16 }
 0x39a   : > { %s3903_s20 = sld [smem:[#allocation20_spill]]  ;;  %s3908_s18 = smov %s2550_s19 }
 0x39b   : > { %s3904_s13 = sld [smem:[#allocation18_spill]]  ;;  %s3911_s22 = smov %s2570_s24 }
 0x39c   : > { %s3905_s27 = sld [smem:[#allocation19_spill]] }
 0x39d   : > { %s3907_s16 = smov %s3900_s10 }
 0x39e   :  { %22 = sbr.rel (!%p20_p3) target bundleno = 14 (0xe), region = 100 }
 0x39f   : > { %s3909_s19 = smov %s3902_s21  ;;  %s3910_s21 = smov %s2566_s23 }
 0x3a1   : > { %s3912_s23 = smov %s3904_s13 }
 0x3a2   : > { %s3913_s24 = smov %s3905_s27 }
 0x3a3   :  { %2071 = vsyncpa [#allocation4], 1 }
 0x3a4   :  { %2073 = vsyncpa [#allocation4 + $0x1], 1 }
 0x3a5   :  { %2074 = vsyncpa [#allocation7], 1 }
 0x3a6   :  { %2076 = vsyncpa [#allocation7 + $0x1], 1 }
 0x3a7   :  { %2077 = vsyncpa [#allocation5], 1 }
 0x3a8   :  { %2079 = vsyncpa [#allocation5 + $0x1], 1 }

</bundles_post_ra>
